<compile_context>
chip_gen: v7x
topology: tpu7x:2x2x1
jax: 0.10.0
libtpu: 0.0.40
codegen_flags: <defaults>
</compile_context>

<pallas_src>
import functools

import jax
import jax.numpy as jnp
from jax.experimental import pallas as pl
from jax.experimental.pallas import tpu as pltpu


# ----------------------------------------------------------------------------
# Pallas kernel
# ----------------------------------------------------------------------------

def _attn_kernel(x_ref, w_ref, b_ref, g_ref, o_ref, *, c, cq, b_blk, exp_dtype):
    """Processes `b_blk` batch elements per grid step.

    x_ref: (b_blk, C, HW) f32   activations (NCHW flattened over spatial)
    w_ref: (F, C)         bf16  fused 1x1-conv weights, rows = [Wv; Wq; Wk]
    b_ref: (F, 1)         f32   fused biases
    g_ref: (1,)           f32   gamma scalar (SMEM)
    o_ref: (b_blk, C, HW) f32   gamma * attn_out + x
    """
    w = w_ref[...]                                   # load fused params once
    bias = b_ref[...]
    g = g_ref[0]

    for bb in range(b_blk):                          # static unroll, b_blk small
        x = x_ref[bb]                                # (C, HW) f32

        # Fused q/k/v 1x1-conv projection: (F, C) @ (C, HW) -> (F, HW).
        qkv = jax.lax.dot_general(
            w, x.astype(jnp.bfloat16),
            (((1,), (0,)), ((), ())),
            preferred_element_type=jnp.float32)
        qkv = qkv + bias                             # (F, 1) lane-broadcast add

        v = qkv[:c, :]                               # (C,  HW) sublane-aligned
        q = qkv[c:c + cq, :]                         # (Cq, HW)
        k = qkv[c + cq:, :]                          # (Cq, HW)

        # Key-major scores: s[j, i] = sum_c k[c, j] * q[c, i]  -> (HW_k, HW_q).
        # (No 1/sqrt(d) scaling, matching the PyTorch module.)
        s = jax.lax.dot_general(
            k.astype(jnp.bfloat16), q.astype(jnp.bfloat16),
            (((0,), (0,)), ((), ())),
            preferred_element_type=jnp.float32)

        # Stable softmax over keys (axis 0); normalization deferred past the
        # PV matmul so it touches (C, HW) instead of (HW, HW).
        m = jnp.max(s, axis=0, keepdims=True)                      # (1, HW_q) f32
        p = jnp.exp((s - m).astype(exp_dtype))                     # (HW_k, HW_q)
        l = jnp.sum(p.astype(jnp.float32), axis=0, keepdims=True)  # (1, HW_q) f32
        p_mm = p.astype(jnp.bfloat16)                              # no-op if bf16 exp

        # out[c, i] = sum_j v[c, j] * p[j, i]  -- canonical (contract last/first),
        # no transpose of the (HW, HW) weight matrix needed.
        pv = jax.lax.dot_general(
            v.astype(jnp.bfloat16), p_mm,
            (((1,), (0,)), ((), ())),
            preferred_element_type=jnp.float32)                    # (C, HW_q)

        inv_l = pl.reciprocal(l, approx=True)                      # EUP slot
        o_ref[bb] = g * (pv * inv_l) + x


# ----------------------------------------------------------------------------
# Wrapper helpers
# ----------------------------------------------------------------------------

def fuse_attention_params(params):
    """One-time fusion of the q/k/v 1x1-conv parameters (hoisted out of the
    per-call path). Row order [V | Q | K] keeps the big V slice aligned at
    sublane offset 0."""
    wv, wq, wk = params['wv'], params['wq'], params['wk']
    bv, bq, bk = params['bv'], params['bq'], params['bk']
    c = wv.shape[0]
    assert c % 8 == 0, "channels must be a multiple of 8"
    w_fused = jnp.concatenate([wv, wq, wk], axis=0).astype(jnp.bfloat16)
    b_fused = jnp.concatenate([bv, bq, bk], axis=0).reshape(-1, 1).astype(jnp.float32)
    gamma = params['gamma'].reshape(1).astype(jnp.float32)
    return dict(w=w_fused, b=b_fused, gamma=gamma)


def _device_kind():
    try:
        return jax.devices()[0].device_kind.lower()
    except Exception:
        return ""


def _exp_dtype(kind):
    # bf16 EUP exists on v6e / v7x; v5e (and unknown chips) keep f32 exp.
    if ("v6" in kind) or ("v7" in kind) or ("7x" in kind):
        return jnp.bfloat16
    return jnp.float32


def _batch_dim_semantics(kind):
    # Only CORE_PARALLEL guarantees cross-TensorCore sharding; gate it on v7x
    # (2 TCs / chip). Elsewhere keep the plain "parallel" hint.
    core_parallel = getattr(pltpu, "CORE_PARALLEL", None)
    if core_parallel is not None and (("v7" in kind) or ("7x" in kind)):
        return (core_parallel,)
    return ("parallel",)


def _pick_batch_block(n, max_blk=4):
    # Amortize per-grid-step overhead at larger N while keeping at least two
    # grid steps so a 2-TC chip can split the batch.
    if n <= 2:
        return 1
    best = 1
    for blk in range(2, min(max_blk, n // 2) + 1):
        if n % blk == 0:
            best = blk
    return best


# ----------------------------------------------------------------------------
# Forward pass
# ----------------------------------------------------------------------------

def attention_block(x, fused):
    """x: (N, C, H, W) float32 (PyTorch NCHW); fused: fuse_attention_params()."""
    N, C, H, W = x.shape
    HW = H * W
    F = fused['w'].shape[0]
    Cq = (F - C) // 2
    assert F == C + 2 * Cq

    # Single-pass (HW, HW) scores; gate on VMEM budget.
    score_bytes = HW * HW * (4 + 2)             # f32 scores + (bf16) exp weights
    if score_bytes > 24 * 1024 * 1024:
        # TODO(synk): key-tiled online-softmax path for large feature maps.
        raise NotImplementedError(
            f"H*W={HW} too large for the single-pass attention kernel")

    kind = _device_kind()
    b_blk = _pick_batch_block(N)
    grid = (N // b_blk,)

    x3 = x.reshape(N, C, HW).astype(jnp.float32)     # free reshape, stays NCHW

    # Rough per-step VMEM footprint (double-buffered x/out tiles + params +
    # in-kernel temporaries), with 2x headroom; clamp to sane bounds.
    blk_bytes = b_blk * C * HW * 4
    tmp_bytes = F * HW * 4 + score_bytes + 3 * C * HW * 4 + F * C * 4
    vmem_limit = int(min(max(2 * (4 * blk_bytes + tmp_bytes), 32 << 20), 112 << 20))

    flops_b = 2 * F * C * HW + 2 * Cq * HW * HW + 2 * C * HW * HW
    cost = pl.CostEstimate(
        flops=N * flops_b,
        transcendentals=N * HW * HW,
        bytes_accessed=2 * N * C * HW * 4 + F * C * 2 + F * 4 + 4)

    out = pl.pallas_call(
        functools.partial(_attn_kernel, c=C, cq=Cq, b_blk=b_blk,
                          exp_dtype=_exp_dtype(kind)),
        out_shape=jax.ShapeDtypeStruct((N, C, HW), jnp.float32),
        grid=grid,
        in_specs=[
            pl.BlockSpec((b_blk, C, HW), lambda i: (i, 0, 0)),      # x tile
            pl.BlockSpec((F, C), lambda i: (0, 0)),                 # fused W (bf16)
            pl.BlockSpec((F, 1), lambda i: (0, 0)),                 # fused bias
            pl.BlockSpec(memory_space=pltpu.MemorySpace.SMEM),      # gamma scalar
        ],
        out_specs=pl.BlockSpec((b_blk, C, HW), lambda i: (i, 0, 0)),
        compiler_params=pltpu.CompilerParams(
            dimension_semantics=_batch_dim_semantics(kind),
            vmem_limit_bytes=vmem_limit,
        ),
        cost_estimate=cost,
    )(x3, fused['w'], fused['b'], fused['gamma'])

    return out.reshape(N, C, H, W)


# ----------------------------------------------------------------------------
# Plain-JAX reference (bf16 matmuls / f32 softmax, like the kernel's policy)
# ----------------------------------------------------------------------------

def attention_ref(x, params):
    N, C, H, W = x.shape
    HW = H * W
    x3 = x.reshape(N, C, HW).astype(jnp.float32)
    xb = x3.astype(jnp.bfloat16)

    def proj(wm, bm):
        y = jnp.einsum('fc,bcp->bfp', wm.astype(jnp.bfloat16), xb,
                       preferred_element_type=jnp.float32)
        return y + bm[None, :, None]

    q = proj(params['wq'], params['bq'])                       # (N, Cq, HW)
    k = proj(params['wk'], params['bk'])                       # (N, Cq, HW)
    v = proj(params['wv'], params['bv'])                       # (N, C,  HW)

    s = jnp.einsum('bci,bcj->bij', q.astype(jnp.bfloat16), k.astype(jnp.bfloat16),
                   preferred_element_type=jnp.float32)         # (N, HWq, HWk)
    a = jax.nn.softmax(s, axis=-1)
    out = jnp.einsum('bcj,bij->bci', v.astype(jnp.bfloat16), a.astype(jnp.bfloat16),
                     preferred_element_type=jnp.float32)       # (N, C, HW)
    out = params['gamma'][0] * out + x3
    return out.reshape(N, C, H, W)


# ----------------------------------------------------------------------------
# Main
# ----------------------------------------------------------------------------

if __name__ == "__main__":
    key = jax.random.PRNGKey(0)
    k_x, k_q, k_k, k_v, k_bq, k_bk, k_bv = jax.random.split(key, 7)

    # channels must be a multiple of 8 (query/key width is channels // 8)
    N, C, H, W = 2, 64, 16, 16
    Cq = C // 8
    std = 1.0 / (C ** 0.5)

    params = dict(
        wq=jax.random.normal(k_q, (Cq, C), jnp.float32) * std,
        wk=jax.random.normal(k_k, (Cq, C), jnp.float32) * std,
        wv=jax.random.normal(k_v, (C, C), jnp.float32) * std,
        bq=jax.random.normal(k_bq, (Cq,), jnp.float32) * std,
        bk=jax.random.normal(k_bk, (Cq,), jnp.float32) * std,
        bv=jax.random.normal(k_bv, (C,), jnp.float32) * std,
        gamma=jnp.zeros((1,), jnp.float32),   # matches nn.Parameter(torch.zeros(1))
    )
    x = jax.random.normal(k_x, (N, C, H, W), jnp.float32)      # NCHW like PyTorch

    fwd = jax.jit(attention_block)

    # 1) gamma = 0 (module init): output must equal the input.
    fused0 = fuse_attention_params(params)           # one-time parameter fusion
    y0 = fwd(x, fused0)
    jax.block_until_ready(y0)
    assert y0.shape == (N, C, H, W), y0.shape
    assert bool(jnp.all(jnp.isfinite(y0)))
    assert bool(jnp.allclose(y0, x, atol=1e-6)), float(jnp.max(jnp.abs(y0 - x)))

    # 2) nonzero gamma: exercise the attention path against the JAX reference.
    params_nz = dict(params, gamma=jnp.full((1,), 0.7, jnp.float32))
    fused_nz = fuse_attention_params(params_nz)
    y1 = fwd(x, fused_nz)
    y_ref = attention_ref(x, params_nz)
    jax.block_until_ready((y1, y_ref))
    assert bool(jnp.all(jnp.isfinite(y1)))
    err = float(jnp.max(jnp.abs(y1 - y_ref)))
    assert err < 3e-2, err

    print("KERNEL_OK")
</pallas_src>

<mosaic_0001>
module attributes {stable_mosaic.version = 11 : i64} {
  func.func @_attn_kernel(%arg0: i32, %arg1: memref<1x64x256xf32, #tpu.memory_space<vmem>>, %arg2: memref<80x64xbf16, #tpu.memory_space<vmem>>, %arg3: memref<80x1xf32, #tpu.memory_space<vmem>>, %arg4: memref<1xf32, #tpu.memory_space<smem>>, %arg5: memref<1x64x256xf32, #tpu.memory_space<vmem>>) attributes {dimension_semantics = [#tpu.dimension_semantics<parallel>], iteration_bounds = array<i64: 2>, scalar_prefetch = 0 : i64, scratch_operands = 0 : i64, tpu.core_type = #tpu.core_type<tc>, window_params = [{transform_indices = @transform_0, window_bounds = array<i64: 1, 64, 256>}, {pipeline_mode = #tpu.pipeline_mode<synchronous>, transform_indices = @transform_1, window_bounds = array<i64: 80, 64>}, {pipeline_mode = #tpu.pipeline_mode<synchronous>, transform_indices = @transform_2, window_bounds = array<i64: 80, 1>}, {transform_indices = @transform_3, window_bounds = array<i64: 1>}, {transform_indices = @transform_4, window_bounds = array<i64: 1, 64, 256>}]} {
    %c0 = arith.constant 0 : index
    %c0_0 = arith.constant 0 : index
    %0 = vector.load %arg2[%c0, %c0_0] : memref<80x64xbf16, #tpu.memory_space<vmem>>, vector<80x64xbf16>
    %c0_1 = arith.constant 0 : index
    %c0_2 = arith.constant 0 : index
    %1 = vector.load %arg3[%c0_1, %c0_2] : memref<80x1xf32, #tpu.memory_space<vmem>>, vector<80x1xf32>
    %c0_3 = arith.constant 0 : index
    %2 = memref.load %arg4[%c0_3] : memref<1xf32, #tpu.memory_space<smem>>
    %c0_4 = arith.constant 0 : index
    %c0_5 = arith.constant 0 : index
    %c0_6 = arith.constant 0 : index
    %3 = vector.load %arg1[%c0_4, %c0_5, %c0_6] : memref<1x64x256xf32, #tpu.memory_space<vmem>>, vector<1x64x256xf32>
    %4 = vector.shape_cast %3 : vector<1x64x256xf32> to vector<64x256xf32>
    %5 = arith.truncf %4 : vector<64x256xf32> to vector<64x256xbf16>
    %cst = arith.constant dense<0.000000e+00> : vector<80x256xf32>
    %6 = tpu.matmul %0, %5, %cst {dimension_numbers = #tpu.dot_dimension_numbers<[1], [0], [0], [1], [0, 0, 1, 1], [], []>} : vector<80x64xbf16>, vector<64x256xbf16>, vector<80x256xf32> -> vector<80x256xf32>
    %7 = vector.broadcast %1 : vector<80x1xf32> to vector<80x256xf32>
    %8 = arith.addf %6, %7 : vector<80x256xf32>
    %9 = vector.extract_strided_slice %8 {offsets = [0, 0], sizes = [64, 256], strides = [1, 1]} : vector<80x256xf32> to vector<64x256xf32>
    %10 = vector.extract_strided_slice %8 {offsets = [64, 0], sizes = [8, 256], strides = [1, 1]} : vector<80x256xf32> to vector<8x256xf32>
    %11 = vector.extract_strided_slice %8 {offsets = [72, 0], sizes = [8, 256], strides = [1, 1]} : vector<80x256xf32> to vector<8x256xf32>
    %12 = arith.truncf %11 : vector<8x256xf32> to vector<8x256xbf16>
    %13 = arith.truncf %10 : vector<8x256xf32> to vector<8x256xbf16>
    %cst_7 = arith.constant dense<0.000000e+00> : vector<256x256xf32>
    %14 = tpu.matmul %12, %13, %cst_7 {dimension_numbers = #tpu.dot_dimension_numbers<[0], [0], [1], [1], [0, 1, 1, 1], [], []>} : vector<8x256xbf16>, vector<8x256xbf16>, vector<256x256xf32> -> vector<256x256xf32>
    %cst_8 = arith.constant dense<0xFF800000> : vector<256xf32>
    %15 = vector.multi_reduction <maximumf>, %14, %cst_8 [0] : vector<256x256xf32> to vector<256xf32>
    %16 = vector.shape_cast %15 : vector<256xf32> to vector<1x256xf32>
    %17 = vector.broadcast %16 : vector<1x256xf32> to vector<256x256xf32>
    %18 = arith.subf %14, %17 : vector<256x256xf32>
    %19 = math.exp %18 : vector<256x256xf32>
    %cst_9 = arith.constant dense<0.000000e+00> : vector<256xf32>
    %20 = vector.multi_reduction <add>, %19, %cst_9 [0] : vector<256x256xf32> to vector<256xf32>
    %21 = vector.shape_cast %20 : vector<256xf32> to vector<1x256xf32>
    %22 = arith.truncf %19 : vector<256x256xf32> to vector<256x256xbf16>
    %23 = arith.truncf %9 : vector<64x256xf32> to vector<64x256xbf16>
    %cst_10 = arith.constant dense<0.000000e+00> : vector<64x256xf32>
    %24 = tpu.matmul %23, %22, %cst_10 {dimension_numbers = #tpu.dot_dimension_numbers<[1], [0], [0], [1], [0, 0, 1, 1], [], []>} : vector<64x256xbf16>, vector<256x256xbf16>, vector<64x256xf32> -> vector<64x256xf32>
    %25 = tpu.reciprocal %21 {approx = true} : vector<1x256xf32> -> vector<1x256xf32>
    %26 = vector.broadcast %25 : vector<1x256xf32> to vector<64x256xf32>
    %27 = arith.mulf %24, %26 : vector<64x256xf32>
    %28 = vector.broadcast %2 : f32 to vector<64x256xf32>
    %29 = arith.mulf %28, %27 : vector<64x256xf32>
    %30 = arith.addf %29, %4 : vector<64x256xf32>
    %c0_11 = arith.constant 0 : index
    %c0_12 = arith.constant 0 : index
    %c0_13 = arith.constant 0 : index
    %31 = vector.load %arg5[%c0_11, %c0_12, %c0_13] : memref<1x64x256xf32, #tpu.memory_space<vmem>>, vector<1x64x256xf32>
    %32 = vector.shape_cast %31 : vector<1x64x256xf32> to vector<64x256xf32>
    %33 = vector.shape_cast %30 : vector<64x256xf32> to vector<1x64x256xf32>
    tpu.vector_store %arg5[%c0_11, %c0_12, %c0_13], %33 {strides = array<i32>} : memref<1x64x256xf32, #tpu.memory_space<vmem>>, vector<1x64x256xf32>,
    return
  }
  func.func @transform_0(%arg0: i32) -> (i32, i32, i32) {
    %c0_i32 = arith.constant 0 : i32
    %c0_i32_0 = arith.constant 0 : i32
    %c0_i32_1 = arith.constant 0 : i32
    return %arg0, %c0_i32, %c0_i32_0 : i32, i32, i32
  }
  func.func @transform_1(%arg0: i32) -> (i32, i32) {
    %c0_i32 = arith.constant 0 : i32
    %c0_i32_0 = arith.constant 0 : i32
    %c0_i32_1 = arith.constant 0 : i32
    return %c0_i32, %c0_i32_0 : i32, i32
  }
  func.func @transform_2(%arg0: i32) -> (i32, i32) {
    %c0_i32 = arith.constant 0 : i32
    %c0_i32_0 = arith.constant 0 : i32
    %c0_i32_1 = arith.constant 0 : i32
    return %c0_i32, %c0_i32_0 : i32, i32
  }
  func.func @transform_3(%arg0: i32) -> i32 {
    %c0_i32 = arith.constant 0 : i32
    %c0_i32_0 = arith.constant 0 : i32
    return %c0_i32 : i32
  }
  func.func @transform_4(%arg0: i32) -> (i32, i32, i32) {
    %c0_i32 = arith.constant 0 : i32
    %c0_i32_0 = arith.constant 0 : i32
    %c0_i32_1 = arith.constant 0 : i32
    return %arg0, %c0_i32, %c0_i32_0 : i32, i32, i32
  }
}

</mosaic_0001>

<bundles_post_ra>
// kernel: attention_block.1
= control target key start
LH: loop header
LB: loop body
LE: loop exit
PB: predicated region body
PF: predicated region fallthrough
CT: control target
= control target key end

     0   :  { %s1520_s17 = smov 0   ;;  %s2427_s0 = inlined_call_operand.vmem [shape: f32[2,64,256], index: 0, kind: input, shape index: {}]   ;;  %s2428_s1 = inlined_call_operand.vmem [shape: bf16[80,64], index: 1, kind: input, shape index: {}]   ;;  %s2429_s2 = inlined_call_operand.vmem [shape: f32[80,1], index: 2, kind: input, shape index: {}]   ;;  %s2430_s3 = inlined_call_operand.<no memory space> [shape: f32[1], index: 3, kind: input, shape index: {}]   ;;  %s2431_s4 = inlined_call_operand.vmem [shape: f32[2,64,256], index: 4, kind: output, shape index: {}]  }
   0x1   :  { %9 = sst [smem:[#allocation2]] %s2430_s3 }
   0x2 LB: > { %s1279_s18 = sadd.s32 4294967295, %s1489_s17   ;;  %p1283_p0 = scmp.ge.s32.totalorder %s1489_s17, 1  ;;  %s1489_s17 = sphi %s1520_s17, %s15_s17  }
   0x3   : > { %p163_p1 = scmp.lt.s32.totalorder %s1489_s17, 3 }
   0x5   : > { %p164_p2 = pnand %p1283_p0, %p163_p1 }
   0x7   : > { %167 = sbr.rel (%p164_p2) target bundleno = 1108 (0x454), region = 36 }
   0xe   : > { %p189_p3 = scmp.lt.s32.totalorder %s1279_s18, 1  ;;  %v1491_v0 = vmov 0   ;;  %v219_v1 = vld [vmem:[%s2429_s2 + $0x48] sm:$0xff]  ;;  %v218_v2 = vld [vmem:[%s2429_s2 + $0x40] sm:$0xff]  ;;  %v212_v29 = vld [vmem:[%s2429_s2 + $0x10] sm:$0xff]  ;;  %vm320_vm0 = vcmask 523264  }
   0xf   : > { %368 = vmatprep.mubr.bf16.mxu0 %v1491_v0  ;;  %1328 = vset.pattern.permute.xlu0 %v1491_v0  ;;  %v210_v20 = vld [vmem:[%s2429_s2] sm:$0xff]  ;;  %v211_v27 = vld [vmem:[%s2429_s2 + $0x8] sm:$0xff]  ;;  %v213_v31 = vld [vmem:[%s2429_s2 + $0x18] sm:$0xff]  ;;  %vm504_vm1 = vcmask 1043456   ;;  %vm455_vm2 = vcmask 64512   ;;  %s220_s29 = sld [smem:[#allocation2]] }
  0x10   : > { %s2626_s18 = smov (!%p189_p3, %s1279_s18), 1  ;;  %543 = vmatprep.mubr.bf16.mxu1 %v1491_v0  ;;  %292 = vperm.xlu0 %1328, %v219_v1   ;;  %v1330_v30 = vld [vmem:[%s2428_s1] sm:$0xff]   ;;  %v1331_v33 = vld [vmem:[%s2428_s1 + $0x8] sm:$0xff]   ;;  %v216_v35 = vld [vmem:[%s2429_s2 + $0x30] sm:$0xff] }
  0x11   : > { %s1317_s3 = sshll.u32 %s2626_s18, 7  ;;  %v214_v32 = vld [vmem:[%s2429_s2 + $0x20] sm:$0xff]  ;;  %v215_v34 = vld [vmem:[%s2429_s2 + $0x28] sm:$0xff]  ;;  %v1332_v36 = vld [vmem:[%s2428_s1 + $0x10] sm:$0xff]  }
  0x12   : > { %s1539_s21 = scalar_lea.vmem %s2427_s0, %s1317_s3  ;;  %v1333_v37 = vld [vmem:[%s2428_s1 + $0x18] sm:$0xff]   ;;  %v1334_v38 = vld [vmem:[%s2428_s1 + $0x20] sm:$0xff]   ;;  %s2362_s6 = scalar_lea.vmem %s2431_s4, %s1317_s3 }
  0x13   : > { %v222_v3 = vld [vmem:[%s1539_s21 + $0x8] sm:$0xff]  ;;  %v224_v4 = vld [vmem:[%s1539_s21 + $0x18] sm:$0xff]  ;;  %v221_v5 = vld [vmem:[%s1539_s21] sm:$0xff] }
  0x14   : > { %v238_v6 = vpack.c.bf16 %v224_v4, %v222_v3  ;;  %v223_v7 = vld [vmem:[%s1539_s21 + $0x10] sm:$0xff]  ;;  %v226_v8 = vld [vmem:[%s1539_s21 + $0x28] sm:$0xff]  ;;  %v228_v9 = vld [vmem:[%s1539_s21 + $0x38] sm:$0xff]  ;;  %287 = vperm.xlu0 %1328, %v218_v2  }
  0x15   : > { %v237_v10 = vpack.c.bf16 %v223_v7, %v221_v5  ;;  %v240_v11 = vpack.c.bf16 %v228_v9, %v226_v8  ;;  %v225_v12 = vld [vmem:[%s1539_s21 + $0x20] sm:$0xff]  ;;  %v227_v13 = vld [vmem:[%s1539_s21 + $0x30] sm:$0xff]  ;;  %v230_v14 = vld [vmem:[%s1539_s21 + $0x48] sm:$0xff] }
  0x16   : > { %336 = vmatprep.subr.bf16.mxu0 %v238_v6  ;;  %v232_v15 = vld [vmem:[%s1539_s21 + $0x58] sm:$0xff]  ;;  %v239_v16 = vpack.c.bf16 %v227_v13, %v225_v12  ;;  %v229_v18 = vld [vmem:[%s1539_s21 + $0x40] sm:$0xff]  ;;  %v231_v19 = vld [vmem:[%s1539_s21 + $0x50] sm:$0xff] }
  0x17   : > { %337 = vmatpush1.bf16.msra.mxu0 %v237_v10  ;;  %v242_v17 = vpack.c.bf16 %v232_v15, %v230_v14  ;;  %v234_v21 = vld [vmem:[%s1539_s21 + $0x68] sm:$0xff]  ;;  %v236_v22 = vld [vmem:[%s1539_s21 + $0x78] sm:$0xff]  ;;  %v241_v23 = vpack.c.bf16 %v231_v19, %v229_v18  ;;  %v233_v25 = vld [vmem:[%s1539_s21 + $0x60] sm:$0xff] }
  0x18   : > { %338 = vmatprep.subr.bf16.mxu0 %v240_v11  ;;  %247 = vperm.xlu0 %1328, %v210_v20   ;;  %v244_v24 = vpack.c.bf16 %v236_v22, %v234_v21  ;;  %v235_v26 = vld [vmem:[%s1539_s21 + $0x70] sm:$0xff] }
  0x19   : > { %v243_v28 = vpack.c.bf16 %v235_v26, %v233_v25 }
  0x1b   : > { %339 = vmatpush1.bf16.msra.mxu0 %v239_v16 }
  0x1c   : > { %340 = vmatprep.subr.bf16.mxu0 %v242_v17  ;;  %252 = vperm.xlu0 %1328, %v211_v27  }
  0x1f   : > { %341 = vmatpush1.bf16.msra.mxu0 %v241_v23 }
  0x20   : > { %342 = vmatprep.subr.bf16.mxu0 %v244_v24  ;;  %257 = vperm.xlu0 %1328, %v212_v29  }
  0x23   : > { %343 = vmatpush1.bf16.msra.mxu0 %v243_v28 }
  0x24   : > { %262 = vperm.xlu0 %1328, %v213_v31   ;;  %v217_v31 = vld [vmem:[%s2429_s2 + $0x38] sm:$0xff] }
  0x26   : > { %1293 = vmatmul.mubr.msk.bf16.vlgmr.msra.gmra.mrb[0].mxu0 %vm320_vm0, %v1330_v30 }
  0x27   : > { %378 = vmatprep.mubr.bf16.mxu0 %v1491_v0 }
  0x28   : > { %267 = vperm.xlu0 %1328, %v214_v32  }
  0x2c   : > { %272 = vperm.xlu0 %1328, %v215_v34  }
  0x2e   : > { %1294 = vmatmul.mubr.msk.bf16.gmra.mrb[4].mxu0 %vm320_vm0, %v1331_v33 }
  0x2f   : > { %388 = vmatprep.mubr.bf16.mxu0 %v1491_v0 }
  0x30   : > { %277 = vperm.xlu0 %1328, %v216_v35  }
  0x36   : > { %1295 = vmatmul.mubr.msk.bf16.gmra.mrb[8].mxu0 %vm320_vm0, %v1332_v36 }
  0x37   : > { %398 = vmatprep.mubr.bf16.mxu0 %v1491_v0 }
  0x3e   : > { %1296 = vmatmul.mubr.msk.bf16.gmra.mrb[12].mxu0 %vm320_vm0, %v1333_v37 }
  0x3f   : > { %408 = vmatprep.mubr.bf16.mxu0 %v1491_v0 }
  0x46   : > { %1297 = vmatmul.mubr.msk.bf16.gmra.mrb[16].mxu0 %vm320_vm0, %v1334_v38 }
  0x8f   : > { %v293_v39 = vpop.permute.xlu0 %292 }
  0x93   : > { %v288_v40 = vpop.permute.xlu0 %287 }
  0x97   : > { %v248_v41 = vpop.permute.xlu0 %247 }
  0x9b   : > { %v253_v42 = vpop.permute.xlu0 %252 }
  0x9f   : > { %v258_v43 = vpop.permute.xlu0 %257 }
  0xa3   : > { %v263_v52 = vpop.permute.xlu0 %262 }
  0xa7   : > { %v268_v58 = vpop.permute.xlu0 %267 }
  0xab   : > { %v273_v4 = vpop.permute.xlu0 %272 }
  0xf9   : > { %v370_v44 = vpop.f32.mrb[0].mxu0 }
  0xfa   : > { %v372_v45 = vpop.f32.mrb[1].mxu0  ;;  %v1608_v47 = vadd.f32 %v370_v44, %v248_v41 }
  0xfb   : > { %v374_v46 = vpop.f32.mrb[2].mxu0  ;;  %v373_v50 = vadd.f32 %v372_v45, %v248_v41 }
  0xfc   : > { %2488 = vst [vmem:[#allocation3_spill] sm:$0xff] %v1608_v47  ;;  %v1610_v48 = vadd.f32 %v374_v46, %v253_v42  ;;  %v376_v49 = vpop.f32.mrb[3].mxu0 }
  0xfd   : > { %v377_v51 = vadd.f32 %v376_v49, %v253_v42 }
  0xfe   : > { %2489 = vst [vmem:[#allocation4_spill] sm:$0xff] %v1610_v48 }
  0xff   : > { %v1077_v54 = vpack.c.bf16 %v377_v51, %v373_v50  ;;  %v278_v50 = vpop.permute.xlu0 %277 }
 0x101   : > { %v380_v55 = vpop.f32.mrb[4].mxu0  ;;  %1116 = vmatprep.mubr.bf16.mxu0 %v1077_v54 }
 0x102   : > { %v382_v56 = vpop.f32.mrb[5].mxu0  ;;  %v1614_v59 = vadd.f32 %v380_v55, %v258_v43 }
 0x103   : > { %v384_v57 = vpop.f32.mrb[6].mxu0  ;;  %v1618_v62 = vadd.f32 %v382_v56, %v258_v43 }
 0x104   : > { %2490 = vst [vmem:[#allocation5_spill] sm:$0xff] %v1614_v59  ;;  %v1616_v60 = vadd.f32 %v384_v57, %v263_v52  ;;  %v386_v61 = vpop.f32.mrb[7].mxu0 }
 0x105   : > { %2492 = vst [vmem:[#allocation7_spill] sm:$0xff] %v1618_v62  ;;  %v1620_v63 = vadd.f32 %v386_v61, %v263_v52 }
 0x106   : > { %2491 = vst [vmem:[#allocation6_spill] sm:$0xff] %v1616_v60 }
 0x107   : > { %2493 = vst [vmem:[#allocation8_spill] sm:$0xff] %v1620_v63 }
 0x109   : > { %v390_v3 = vpop.f32.mrb[8].mxu0 }
 0x10a   : > { %v392_v5 = vpop.f32.mrb[9].mxu0  ;;  %v1626_v7 = vadd.f32 %v390_v3, %v268_v58 }
 0x10b   : > { %v394_v6 = vpop.f32.mrb[10].mxu0  ;;  %v1630_v10 = vadd.f32 %v392_v5, %v268_v58 }
 0x10c   : > { %2494 = vst [vmem:[#allocation9_spill] sm:$0xff] %v1626_v7  ;;  %v1628_v8 = vadd.f32 %v394_v6, %v273_v4  ;;  %v396_v9 = vpop.f32.mrb[11].mxu0 }
 0x10d   : > { %2496 = vst [vmem:[#allocation11_spill] sm:$0xff] %v1630_v10  ;;  %v1632_v11 = vadd.f32 %v396_v9, %v273_v4 }
 0x10e   : > { %2495 = vst [vmem:[#allocation10_spill] sm:$0xff] %v1628_v8 }
 0x10f   : > { %2497 = vst [vmem:[#allocation12_spill] sm:$0xff] %v1632_v11 }
 0x111   : > { %v1638_v14 = vpop.f32.mrb[12].mxu0 }
 0x112   : > { %v1640_v15 = vpop.f32.mrb[13].mxu0  ;;  %v1673_v52 = vadd.f32 %v1638_v14, %v278_v50 }
 0x113   : > { %v1642_v16 = vpop.f32.mrb[14].mxu0  ;;  %v1676_v54 = vadd.f32 %v1640_v15, %v278_v50 }
 0x114   : > { %v1644_v17 = vpop.f32.mrb[15].mxu0  ;;  %2498 = vst [vmem:[#allocation13_spill] sm:$0xff] %v1673_v52 }
 0x115   : > { %2499 = vst [vmem:[#allocation14_spill] sm:$0xff] %v1676_v54 }
 0x119   : > { %v410_v18 = vpop.f32.mrb[16].mxu0 }
 0x11a   : > { %v411_v19 = vadd.f32 %v410_v18, %v288_v40  ;;  %v412_v20 = vpop.f32.mrb[17].mxu0 }
 0x11b   : > { %v413_v21 = vadd.f32 %v412_v20, %v288_v40  ;;  %v414_v22 = vpop.f32.mrb[18].mxu0 }
 0x11c   : > { %v421_v23 = vpack.c.bf16 %v411_v19, %v411_v19  ;;  %v416_v24 = vpop.f32.mrb[19].mxu0  ;;  %v415_v25 = vadd.f32 %v414_v22, %v293_v39 }
 0x11d   : > { %v422_v26 = vpack.c.bf16 %v413_v21, %v413_v21  ;;  %v417_v29 = vadd.f32 %v416_v24, %v293_v39 }
 0x11e   : > { %v419_v27 = vpack.c.bf16 %v415_v25, %v415_v25  ;;  %v506_v28 = vsel %vm504_vm1, %v421_v23, 0 }
 0x11f   : > { %1298 = vmatprep.subr.msk.bf16.mxu1 %vm504_vm1, %v422_v26  ;;  %v420_v30 = vpack.c.bf16 %v417_v29, %v417_v29 }
 0x120   : > { %423 = vxpose.xlu1.c.b16.start.end [1/1] (short) %v419_v27, 128  ;;  %512 = vmatpush1.bf16.msra.mxu1 %v506_v28 }
 0x13d   : > { %439 = vxpose.xlu1.c.b16.start.end [1/1] (short) %v420_v30, 128 }
 0x141   : > { %1329 = vset.pattern.permute.xlu1 %v1491_v0 }
 0x15d   : > { %282 = vperm.xlu1 %1329, %v217_v31  }
 0x186   : > { %v431_v32 = vpop.trf.xlu1 }
 0x187   : > { %1299 = vmatmul.mubr.msk.bf16.vlgmr.msra.gmra.mrb[0].mxu1 %vm455_vm2, %v431_v32 }
 0x188   : > { %553 = vmatprep.mubr.bf16.mxu1 %v1491_v0 }
 0x18a   : > { %v432_v33 = vpop.trf.xlu1 }
 0x18e   : > { %v433_v34 = vpop.trf.xlu1 }
 0x18f   : > { %1300 = vmatmul.mubr.msk.bf16.gmra.mrb[4].mxu1 %vm455_vm2, %v432_v33 }
 0x190   : > { %563 = vmatprep.mubr.bf16.mxu1 %v1491_v0 }
 0x192   : > { %v434_v35 = vpop.trf.xlu1 }
 0x196   : > { %v435_v36 = vpop.trf.xlu1 }
 0x197   : > { %1301 = vmatmul.mubr.msk.bf16.gmra.mrb[8].mxu1 %vm455_vm2, %v433_v34 }
 0x198   : > { %573 = vmatprep.mubr.bf16.mxu1 %v1491_v0 }
 0x19a   : > { %v436_v37 = vpop.trf.xlu1 }
 0x19e   : > { %v437_v38 = vpop.trf.xlu1 }
 0x19f   : > { %1302 = vmatmul.mubr.msk.bf16.gmra.mrb[12].mxu1 %vm455_vm2, %v434_v35 }
 0x1a0   : > { %583 = vmatprep.mubr.bf16.mxu1 %v1491_v0 }
 0x1a2   : > { %v438_v39 = vpop.trf.xlu1 }
 0x1a6   : > { %v447_v40 = vpop.trf.xlu1 }
 0x1a7   : > { %1303 = vmatmul.mubr.msk.bf16.gmra.mrb[16].mxu1 %vm455_vm2, %v435_v36 }
 0x1a8   : > { %593 = vmatprep.mubr.bf16.mxu1 %v1491_v0 }
 0x1aa   : > { %v448_v41 = vpop.trf.xlu1 }
 0x1ae   : > { %v449_v42 = vpop.trf.xlu1 }
 0x1af   : > { %1304 = vmatmul.mubr.msk.bf16.gmra.mrb[20].mxu1 %vm455_vm2, %v436_v37 }
 0x1b0   : > { %603 = vmatprep.mubr.bf16.mxu1 %v1491_v0 }
 0x1b2   : > { %v450_v43 = vpop.trf.xlu1 }
 0x1b6   : > { %v451_v44 = vpop.trf.xlu1 }
 0x1b7   : > { %1305 = vmatmul.mubr.msk.bf16.gmra.mrb[24].mxu1 %vm455_vm2, %v437_v38 }
 0x1b8   : > { %613 = vmatprep.mubr.bf16.mxu1 %v1491_v0 }
 0x1ba   : > { %v452_v45 = vpop.trf.xlu1 }
 0x1be   : > { %v453_v46 = vpop.trf.xlu1 }
 0x1bf   : > { %1306 = vmatmul.mubr.msk.bf16.gmra.mrb[28].mxu1 %vm455_vm2, %v438_v39 }
 0x1c0   : > { %623 = vmatprep.mubr.bf16.mxu1 %v1491_v0 }
 0x1c2   : > { %v454_v49 = vpop.trf.xlu1 }
 0x1c7   : > { %1307 = vmatmul.mubr.msk.bf16.gmra.mrb[32].mxu1 %vm455_vm2, %v447_v40 }
 0x1c8   : > { %633 = vmatprep.mubr.bf16.mxu1 %v1491_v0 }
 0x1cf   : > { %1308 = vmatmul.mubr.msk.bf16.gmra.mrb[36].mxu1 %vm455_vm2, %v448_v41 }
 0x1d0   : > { %643 = vmatprep.mubr.bf16.mxu1 %v1491_v0 }
 0x1d7   : > { %1309 = vmatmul.mubr.msk.bf16.gmra.mrb[40].mxu1 %vm455_vm2, %v449_v42 }
 0x1d8   : > { %653 = vmatprep.mubr.bf16.mxu1 %v1491_v0 }
 0x1dc   : > { %v283_v51 = vpop.permute.xlu1 %282 }
 0x1dd   : > { %v1679_v55 = vadd.f32 %v1642_v16, %v283_v51  ;;  %v1682_v56 = vadd.f32 %v1644_v17, %v283_v51 }
 0x1df   : > { %2500 = vst [vmem:[#allocation15_spill] sm:$0xff] %v1679_v55  ;;  %2501 = vst [vmem:[#allocation16_spill] sm:$0xff] %v1682_v56  ;;  %1310 = vmatmul.mubr.msk.bf16.gmra.mrb[44].mxu1 %vm455_vm2, %v450_v43 }
 0x1e0   : > { %663 = vmatprep.mubr.bf16.mxu1 %v1491_v0 }
 0x1e7   : > { %1311 = vmatmul.mubr.msk.bf16.gmra.mrb[48].mxu1 %vm455_vm2, %v451_v44 }
 0x1e8   : > { %673 = vmatprep.mubr.bf16.mxu1 %v1491_v0 }
 0x1ef   : > { %1312 = vmatmul.mubr.msk.bf16.gmra.mrb[52].mxu1 %vm455_vm2, %v452_v45 }
 0x1f0   : > { %683 = vmatprep.mubr.bf16.mxu1 %v1491_v0 }
 0x1f7   : > { %1313 = vmatmul.mubr.msk.bf16.gmra.mrb[56].mxu1 %vm455_vm2, %v453_v46 }
 0x1f8   : > { %693 = vmatprep.mubr.bf16.mxu1 %v1491_v0 }
 0x1ff   : > { %1314 = vmatmul.mubr.msk.bf16.gmra.mrb[60].mxu1 %vm455_vm2, %v454_v49 }
 0x25a   : > { %v1697_v61 = vpop.f32.mrb[0].mxu1 }
 0x25b   : > { %v1699_v3 = vpop.f32.mrb[1].mxu1 }
 0x25c   : > { %v1701_v4 = vpop.f32.mrb[2].mxu1 }
 0x25d   : > { %v1703_v5 = vpop.f32.mrb[3].mxu1 }
 0x262   : > { %v1705_v6 = vpop.f32.mrb[4].mxu1 }
 0x263   : > { %v704_v9 = vmax.f32 %v1697_v61, %v1705_v6  ;;  %v1709_v14 = vpop.f32.mrb[5].mxu1 }
 0x264   : > { %v741_v0 = vmax.f32 %v1699_v3, %v1709_v14  ;;  %v1713_v15 = vpop.f32.mrb[6].mxu1 }
 0x265   : > { %v705_v16 = vmax.f32 %v1701_v4, %v1713_v15  ;;  %v1717_v17 = vpop.f32.mrb[7].mxu1 }
 0x266   : > { %v742_v18 = vmax.f32 %v1703_v5, %v1717_v17 }
 0x26a   : > { %v1721_v19 = vpop.f32.mrb[8].mxu1 }
 0x26b   : > { %v706_v20 = vmax.f32 %v704_v9, %v1721_v19  ;;  %v1724_v21 = vpop.f32.mrb[9].mxu1 }
 0x26c   : > { %v743_v22 = vmax.f32 %v741_v0, %v1724_v21  ;;  %v1727_v23 = vpop.f32.mrb[10].mxu1 }
 0x26d   : > { %v707_v24 = vmax.f32 %v705_v16, %v1727_v23  ;;  %v1730_v25 = vpop.f32.mrb[11].mxu1 }
 0x26e   : > { %v744_v26 = vmax.f32 %v742_v18, %v1730_v25 }
 0x272   : > { %v1733_v27 = vpop.f32.mrb[12].mxu1 }
 0x273   : > { %v708_v28 = vmax.f32 %v706_v20, %v1733_v27  ;;  %v1736_v29 = vpop.f32.mrb[13].mxu1 }
 0x274   : > { %v745_v30 = vmax.f32 %v743_v22, %v1736_v29  ;;  %v1739_v31 = vpop.f32.mrb[14].mxu1 }
 0x275   : > { %v709_v32 = vmax.f32 %v707_v24, %v1739_v31  ;;  %v1742_v33 = vpop.f32.mrb[15].mxu1 }
 0x276   : > { %v746_v34 = vmax.f32 %v744_v26, %v1742_v33 }
 0x27a   : > { %v1745_v35 = vpop.f32.mrb[16].mxu1 }
 0x27b   : > { %v710_v36 = vmax.f32 %v708_v28, %v1745_v35  ;;  %v1748_v37 = vpop.f32.mrb[17].mxu1 }
 0x27c   : > { %v747_v38 = vmax.f32 %v745_v30, %v1748_v37  ;;  %v1751_v39 = vpop.f32.mrb[18].mxu1 }
 0x27d   : > { %v711_v40 = vmax.f32 %v709_v32, %v1751_v39  ;;  %v1754_v41 = vpop.f32.mrb[19].mxu1 }
 0x27e   : > { %v748_v42 = vmax.f32 %v746_v34, %v1754_v41 }
 0x282   : > { %v1757_v43 = vpop.f32.mrb[20].mxu1 }
 0x283   : > { %v712_v44 = vmax.f32 %v710_v36, %v1757_v43  ;;  %v1760_v45 = vpop.f32.mrb[21].mxu1 }
 0x284   : > { %v749_v46 = vmax.f32 %v747_v38, %v1760_v45  ;;  %v1763_v49 = vpop.f32.mrb[22].mxu1 }
 0x285   : > { %v713_v50 = vmax.f32 %v711_v40, %v1763_v49  ;;  %v1766_v51 = vpop.f32.mrb[23].mxu1 }
 0x286   : > { %2502 = vst [vmem:[#allocation17_spill] sm:$0xff] %v1766_v51  ;;  %v750_v9 = vmax.f32 %v748_v42, %v1766_v51 }
 0x28a   : > { %v1769_v0 = vpop.f32.mrb[24].mxu1 }
 0x28b   : > { %v714_v16 = vmax.f32 %v712_v44, %v1769_v0  ;;  %v1772_v18 = vpop.f32.mrb[25].mxu1 }
 0x28c   : > { %2503 = vst [vmem:[#allocation18_spill] sm:$0xff] %v1772_v18  ;;  %v751_v20 = vmax.f32 %v749_v46, %v1772_v18  ;;  %v1775_v22 = vpop.f32.mrb[26].mxu1 }
 0x28d   : > { %v715_v24 = vmax.f32 %v713_v50, %v1775_v22  ;;  %v1778_v26 = vpop.f32.mrb[27].mxu1 }
 0x28e   : > { %2504 = vst [vmem:[#allocation19_spill] sm:$0xff] %v1778_v26  ;;  %v752_v28 = vmax.f32 %v750_v9, %v1778_v26 }
 0x292   : > { %v1781_v30 = vpop.f32.mrb[28].mxu1 }
 0x293   : > { %v716_v32 = vmax.f32 %v714_v16, %v1781_v30  ;;  %v1784_v34 = vpop.f32.mrb[29].mxu1 }
 0x294   : > { %2505 = vst [vmem:[#allocation20_spill] sm:$0xff] %v1784_v34  ;;  %v753_v36 = vmax.f32 %v751_v20, %v1784_v34  ;;  %v1787_v38 = vpop.f32.mrb[30].mxu1 }
 0x295   : > { %v717_v40 = vmax.f32 %v715_v24, %v1787_v38  ;;  %v1790_v42 = vpop.f32.mrb[31].mxu1 }
 0x296   : > { %2506 = vst [vmem:[#allocation21_spill] sm:$0xff] %v1790_v42  ;;  %v754_v44 = vmax.f32 %v752_v28, %v1790_v42 }
 0x29a   : > { %v1793_v46 = vpop.f32.mrb[32].mxu1 }
 0x29b   : > { %v718_v50 = vmax.f32 %v716_v32, %v1793_v46  ;;  %v1796_v9 = vpop.f32.mrb[33].mxu1 }
 0x29c   : > { %2507 = vst [vmem:[#allocation22_spill] sm:$0xff] %v1796_v9  ;;  %v755_v16 = vmax.f32 %v753_v36, %v1796_v9  ;;  %v1799_v57 = vpop.f32.mrb[34].mxu1 }
 0x29d   : > { %v719_v20 = vmax.f32 %v717_v40, %v1799_v57  ;;  %v1802_v58 = vpop.f32.mrb[35].mxu1 }
 0x29e   : > { %2508 = vst [vmem:[#allocation23_spill] sm:$0xff] %v1802_v58  ;;  %v756_v24 = vmax.f32 %v754_v44, %v1802_v58 }
 0x2a2   : > { %v1805_v12 = vpop.f32.mrb[36].mxu1 }
 0x2a3   : > { %v720_v28 = vmax.f32 %v718_v50, %v1805_v12  ;;  %v1808_v13 = vpop.f32.mrb[37].mxu1 }
 0x2a4   : > { %2509 = vst [vmem:[#allocation24_spill] sm:$0xff] %v1808_v13  ;;  %v757_v32 = vmax.f32 %v755_v16, %v1808_v13  ;;  %v1811_v1 = vpop.f32.mrb[38].mxu1 }
 0x2a5   : > { %v721_v36 = vmax.f32 %v719_v20, %v1811_v1  ;;  %v1814_v2 = vpop.f32.mrb[39].mxu1 }
 0x2a6   : > { %2510 = vst [vmem:[#allocation25_spill] sm:$0xff] %v1814_v2  ;;  %v758_v40 = vmax.f32 %v756_v24, %v1814_v2 }
 0x2aa   : > { %v1817_v53 = vpop.f32.mrb[40].mxu1 }
 0x2ab   : > { %v722_v44 = vmax.f32 %v720_v28, %v1817_v53  ;;  %v1820_v52 = vpop.f32.mrb[41].mxu1 }
 0x2ac   : > { %2511 = vst [vmem:[#allocation26_spill] sm:$0xff] %v1820_v52  ;;  %v759_v50 = vmax.f32 %v757_v32, %v1820_v52  ;;  %v1823_v55 = vpop.f32.mrb[42].mxu1 }
 0x2ad   : > { %v723_v16 = vmax.f32 %v721_v36, %v1823_v55  ;;  %v1826_v54 = vpop.f32.mrb[43].mxu1 }
 0x2ae   : > { %2512 = vst [vmem:[#allocation27_spill] sm:$0xff] %v1826_v54  ;;  %v760_v20 = vmax.f32 %v758_v40, %v1826_v54 }
 0x2b2   : > { %v1829_v56 = vpop.f32.mrb[44].mxu1 }
 0x2b3   : > { %v724_v24 = vmax.f32 %v722_v44, %v1829_v56  ;;  %v1832_v7 = vpop.f32.mrb[45].mxu1 }
 0x2b4   : > { %2513 = vst [vmem:[#allocation28_spill] sm:$0xff] %v1832_v7  ;;  %v761_v28 = vmax.f32 %v759_v50, %v1832_v7  ;;  %v1835_v8 = vpop.f32.mrb[46].mxu1 }
 0x2b5   : > { %v725_v32 = vmax.f32 %v723_v16, %v1835_v8  ;;  %v1838_v10 = vpop.f32.mrb[47].mxu1 }
 0x2b6   : > { %2514 = vst [vmem:[#allocation29_spill] sm:$0xff] %v1838_v10  ;;  %v762_v36 = vmax.f32 %v760_v20, %v1838_v10 }
 0x2ba   : > { %v1841_v11 = vpop.f32.mrb[48].mxu1 }
 0x2bb   : > { %v726_v40 = vmax.f32 %v724_v24, %v1841_v11  ;;  %v1844_v59 = vpop.f32.mrb[49].mxu1 }
 0x2bc   : > { %2515 = vst [vmem:[#allocation30_spill] sm:$0xff] %v1844_v59  ;;  %v763_v44 = vmax.f32 %v761_v28, %v1844_v59  ;;  %v1847_v60 = vpop.f32.mrb[50].mxu1 }
 0x2bd   : > { %v727_v50 = vmax.f32 %v725_v32, %v1847_v60  ;;  %v1850_v62 = vpop.f32.mrb[51].mxu1 }
 0x2be   : > { %2516 = vst [vmem:[#allocation31_spill] sm:$0xff] %v1850_v62  ;;  %v764_v16 = vmax.f32 %v762_v36, %v1850_v62 }
 0x2c2   : > { %v1853_v63 = vpop.f32.mrb[52].mxu1 }
 0x2c3   : > { %v728_v20 = vmax.f32 %v726_v40, %v1853_v63  ;;  %v1856_v47 = vpop.f32.mrb[53].mxu1 }
 0x2c4   : > { %2517 = vst [vmem:[#allocation32_spill] sm:$0xff] %v1856_v47  ;;  %v765_v24 = vmax.f32 %v763_v44, %v1856_v47  ;;  %v1859_v48 = vpop.f32.mrb[54].mxu1 }
 0x2c5   : > { %v729_v28 = vmax.f32 %v727_v50, %v1859_v48  ;;  %v1862_v59 = vpop.f32.mrb[55].mxu1 }
 0x2c6   : > { %2518 = vst [vmem:[#allocation33_spill] sm:$0xff] %v1862_v59  ;;  %v766_v32 = vmax.f32 %v764_v16, %v1862_v59 }
 0x2ca   : > { %v1865_v10 = vpop.f32.mrb[56].mxu1 }
 0x2cb   : > { %v730_v36 = vmax.f32 %v728_v20, %v1865_v10  ;;  %v1868_v62 = vpop.f32.mrb[57].mxu1 }
 0x2cc   : > { %2519 = vst [vmem:[#allocation34_spill] sm:$0xff] %v1868_v62  ;;  %v767_v40 = vmax.f32 %v765_v24, %v1868_v62  ;;  %v1871_v7 = vpop.f32.mrb[58].mxu1 }
 0x2cd   : > { %v731_v44 = vmax.f32 %v729_v28, %v1871_v7  ;;  %v1874_v47 = vpop.f32.mrb[59].mxu1 }
 0x2ce   : > { %2520 = vst [vmem:[#allocation35_spill] sm:$0xff] %v1874_v47  ;;  %v768_v50 = vmax.f32 %v766_v32, %v1874_v47 }
 0x2d2   : > { %v1877_v54 = vpop.f32.mrb[60].mxu1 }
 0x2d3   : > { %v732_v16 = vmax.f32 %v730_v36, %v1877_v54  ;;  %v1880_v59 = vpop.f32.mrb[61].mxu1 }
 0x2d4   : > { %2521 = vst [vmem:[#allocation36_spill] sm:$0xff] %v1880_v59  ;;  %v769_v20 = vmax.f32 %v767_v40, %v1880_v59  ;;  %v1883_v52 = vpop.f32.mrb[62].mxu1 }
 0x2d5   : > { %v733_v24 = vmax.f32 %v731_v44, %v1883_v52  ;;  %v1886_v62 = vpop.f32.mrb[63].mxu1 }
 0x2d6   : > { %2522 = vst [vmem:[#allocation37_spill] sm:$0xff] %v1886_v62  ;;  %v770_v28 = vmax.f32 %v768_v50, %v1886_v62 }
 0x2d7   : > { %v734_v2 = vmax.f32 %v732_v16, %v733_v24 }
 0x2d8   : > { %v771_v13 = vmax.f32 %v769_v20, %v770_v28 }
 0x2d9   : > { %v735_v58 = vrot.slane %v734_v2, 4 }
 0x2da   : > { %v772_v32 = vrot.slane %v771_v13, 4 }
 0x2db   : > { %v736_v47 = vmax.f32 %v734_v2, %v735_v58 }
 0x2dc   : > { %v773_v9 = vmax.f32 %v771_v13, %v772_v32 }
 0x2dd   : > { %v737_v42 = vrot.slane %v736_v47, 2 }
 0x2de   : > { %v774_v36 = vrot.slane %v773_v9, 2 }
 0x2df   : > { %v738_v34 = vmax.f32 %v736_v47, %v737_v42 }
 0x2e0   : > { %v775_v26 = vmax.f32 %v773_v9, %v774_v36 }
 0x2e1   : > { %v739_v18 = vrot.slane %v738_v34, 1 }
 0x2e2   : > { %v776_v40 = vrot.slane %v775_v26, 1 }
 0x2e3   : > { %v1889_v59 = vmax.f32 %v738_v34, %v739_v18 }
 0x2e4   : > { %v1891_v51 = vmax.f32 %v775_v26, %v776_v40 }
 0x2e5   : > { %v778_v44 = vsub.f32 %v1697_v61, %v1889_v59  ;;  %v780_v50 = vsub.f32 %v1701_v4, %v1889_v59  ;;  %v782_v2 = vsub.f32 %v1705_v6, %v1889_v59  ;;  %v784_v13 = vsub.f32 %v1713_v15, %v1889_v59 }
 0x2e6   : > { %v786_v47 = vsub.f32 %v1721_v19, %v1889_v59  ;;  %v788_v58 = vsub.f32 %v1727_v23, %v1889_v59  ;;  %v790_v18 = vsub.f32 %v1733_v27, %v1889_v59  ;;  %v792_v61 = vsub.f32 %v1739_v31, %v1889_v59 }
 0x2e7   : > { %v794_v4 = vsub.f32 %v1745_v35, %v1889_v59  ;;  %v796_v6 = vsub.f32 %v1751_v39, %v1889_v59  ;;  %v798_v15 = vsub.f32 %v1757_v43, %v1889_v59  ;;  %v800_v19 = vsub.f32 %v1763_v49, %v1889_v59 }
 0x2e8   : > { %v802_v23 = vsub.f32 %v1769_v0, %v1889_v59  ;;  %v804_v27 = vsub.f32 %v1775_v22, %v1889_v59  ;;  %v806_v31 = vsub.f32 %v1781_v30, %v1889_v59  ;;  %v808_v35 = vsub.f32 %v1787_v38, %v1889_v59 }
 0x2e9   : > { %v810_v39 = vsub.f32 %v1793_v46, %v1889_v59  ;;  %v812_v43 = vsub.f32 %v1799_v57, %v1889_v59  ;;  %v814_v49 = vsub.f32 %v1805_v12, %v1889_v59  ;;  %v816_v0 = vsub.f32 %v1811_v1, %v1889_v59  ;;  %v2542_v57 = vld [vmem:[#allocation36_spill] sm:$0xff] }
 0x2ea   : > { %v818_v22 = vsub.f32 %v1817_v53, %v1889_v59  ;;  %v820_v26 = vsub.f32 %v1823_v55, %v1889_v59  ;;  %v822_v30 = vsub.f32 %v1829_v56, %v1889_v59  ;;  %v824_v34 = vsub.f32 %v1835_v8, %v1889_v59 }
 0x2eb   : > { %v842_v42 = vmul.f32 1.442695, %v778_v44  ;;  %v846_v46 = vmul.f32 1.442695, %v780_v50  ;;  %v850_v9 = vmul.f32 1.442695, %v782_v2 }
 0x2ec   : > { %v854_v20 = vmul.f32 1.442695, %v784_v13  ;;  %v858_v28 = vmul.f32 1.442695, %v786_v47  ;;  %v862_v32 = vmul.f32 1.442695, %v788_v58 }
 0x2ed   : > { %1335 = vpow2.f32 %v842_v42  ;;  %v866_v36 = vmul.f32 1.442695, %v790_v18  ;;  %v870_v40 = vmul.f32 1.442695, %v792_v61  ;;  %v874_v8 = vmul.f32 1.442695, %v794_v4 }
 0x2ee   : > { %1337 = vpow2.f32 %v846_v46  ;;  %v878_v38 = vmul.f32 1.442695, %v796_v6  ;;  %v882_v44 = vmul.f32 1.442695, %v798_v15  ;;  %v886_v50 = vmul.f32 1.442695, %v800_v19 }
 0x2ef   : > { %1339 = vpow2.f32 %v850_v9  ;;  %v890_v2 = vmul.f32 1.442695, %v802_v23  ;;  %v894_v16 = vmul.f32 1.442695, %v804_v27  ;;  %v898_v13 = vmul.f32 1.442695, %v806_v31 }
 0x2f0   : > { %1341 = vpow2.f32 %v854_v20  ;;  %v902_v56 = vmul.f32 1.442695, %v808_v35  ;;  %v906_v24 = vmul.f32 1.442695, %v810_v39  ;;  %v910_v42 = vmul.f32 1.442695, %v812_v43 }
 0x2f1   : > { %1343 = vpow2.f32 %v858_v28  ;;  %v914_v47 = vmul.f32 1.442695, %v814_v49  ;;  %v918_v58 = vmul.f32 1.442695, %v816_v0  ;;  %v922_v46 = vmul.f32 1.442695, %v818_v22 }
 0x2f2   : > { %1345 = vpow2.f32 %v862_v32  ;;  %v1961_v18 = vmul.f32 1.442695, %v820_v26  ;;  %v1963_v61 = vmul.f32 1.442695, %v822_v30  ;;  %v1965_v4 = vmul.f32 1.442695, %v824_v34 }
 0x2f3   : > { %1347 = vpow2.f32 %v866_v36  ;;  %v2523_v22 = vld [vmem:[#allocation17_spill] sm:$0xff]  ;;  %v2525_v9 = vld [vmem:[#allocation19_spill] sm:$0xff]  ;;  %v2526_v32 = vld [vmem:[#allocation20_spill] sm:$0xff] }
 0x2f4   : > { %1349 = vpow2.f32 %v870_v40  ;;  %v2527_v40 = vld [vmem:[#allocation21_spill] sm:$0xff]  ;;  %v2529_v0 = vld [vmem:[#allocation23_spill] sm:$0xff]  ;;  %v2530_v49 = vld [vmem:[#allocation24_spill] sm:$0xff] }
 0x2f5   : > { %1351 = vpow2.f32 %v874_v8  ;;  %v2524_v8 = vld [vmem:[#allocation18_spill] sm:$0xff]  ;;  %v2531_v36 = vld [vmem:[#allocation25_spill] sm:$0xff]  ;;  %v2533_v31 = vld [vmem:[#allocation27_spill] sm:$0xff] }
 0x2f6   : > { %1353 = vpow2.f32 %v878_v38  ;;  %v2532_v35 = vld [vmem:[#allocation26_spill] sm:$0xff]  ;;  %v2534_v20 = vld [vmem:[#allocation28_spill] sm:$0xff]  ;;  %v2535_v19 = vld [vmem:[#allocation29_spill] sm:$0xff] }
 0x2f7   : > { %v1975_v27 = vpop.eup %1335  ;;  %1355 = vpow2.f32 %v882_v44  ;;  %v2536_v44 = vld [vmem:[#allocation30_spill] sm:$0xff]  ;;  %v2537_v6 = vld [vmem:[#allocation31_spill] sm:$0xff] }
 0x2f8   : > { %v1983_v43 = vpop.eup %1337  ;;  %1357 = vpow2.f32 %v886_v50  ;;  %v2528_v50 = vld [vmem:[#allocation22_spill] sm:$0xff] }
 0x2f9   : > { %v1991_v30 = vpop.eup %1339  ;;  %1359 = vpow2.f32 %v890_v2  ;;  %v970_v34 = vadd.f32 %v1983_v43, %v1975_v27  ;;  %v2541_v2 = vld [vmem:[#allocation35_spill] sm:$0xff] }
 0x2fa   : > { %v1999_v28 = vpop.eup %1341  ;;  %1361 = vpow2.f32 %v894_v16  ;;  %v2539_v16 = vld [vmem:[#allocation33_spill] sm:$0xff] }
 0x2fb   : > { %v2007_v26 = vpop.eup %1343  ;;  %1363 = vpow2.f32 %v898_v13  ;;  %v971_v38 = vadd.f32 %v1991_v30, %v970_v34 }
 0x2fc   : > { %v2014_v39 = vpop.eup %1345  ;;  %1365 = vpow2.f32 %v902_v56 }
 0x2fd   : > { %v2022_v23 = vpop.eup %1347  ;;  %1367 = vpow2.f32 %v906_v24  ;;  %v972_v34 = vadd.f32 %v1999_v28, %v971_v38 }
 0x2fe   : > { %v2029_v15 = vpop.eup %1349  ;;  %1369 = vpow2.f32 %v910_v42 }
 0x2ff   : > { %v2037_v53 = vpop.eup %1351  ;;  %1371 = vpow2.f32 %v914_v47  ;;  %v973_v38 = vadd.f32 %v2007_v26, %v972_v34  ;;  %v2543_v34 = vsub.f32 %v1841_v11, %v1889_v59 }
 0x300   : > { %v2044_v12 = vpop.eup %1353  ;;  %1373 = vpow2.f32 %v918_v58  ;;  %v2544_v58 = vsub.f32 %v1847_v60, %v1889_v59 }
 0x301   : > { %v2052_v55 = vpop.eup %1355  ;;  %1375 = vpow2.f32 %v922_v46  ;;  %v938_v56 = vmul.f32 1.442695, %v2543_v34  ;;  %v974_v42 = vadd.f32 %v2014_v39, %v973_v38  ;;  %v2545_v46 = vsub.f32 %v1853_v63, %v1889_v59 }
 0x302   : > { %v2058_v1 = vpop.eup %1357  ;;  %1377 = vpow2.f32 %v1961_v18  ;;  %v942_v24 = vmul.f32 1.442695, %v2544_v58  ;;  %v2546_v18 = vsub.f32 %v1859_v48, %v1889_v59  ;;  %v2550_v48 = vsub.f32 %v1877_v54, %v1889_v59 }
 0x303   : > { %v2064_v13 = vpop.eup %1359  ;;  %1379 = vpow2.f32 %v1963_v61  ;;  %v946_v47 = vmul.f32 1.442695, %v2545_v46  ;;  %v975_v11 = vadd.f32 %v2022_v23, %v974_v42  ;;  %v2547_v61 = vsub.f32 %v1865_v10, %v1889_v59 }
 0x304   : > { %v2071_v34 = vpop.eup %1361  ;;  %1381 = vpow2.f32 %v1965_v4  ;;  %v950_v38 = vmul.f32 1.442695, %v2546_v18  ;;  %v2548_v42 = vsub.f32 %v1871_v7, %v1889_v59 }
 0x305   : > { %v2077_v60 = vpop.eup %1363  ;;  %1383 = vpow2.f32 %v938_v56  ;;  %v954_v58 = vmul.f32 1.442695, %v2547_v61  ;;  %v976_v63 = vadd.f32 %v2029_v15, %v975_v11  ;;  %v962_v56 = vmul.f32 1.442695, %v2550_v48 }
 0x306   : > { %v2083_v46 = vpop.eup %1365  ;;  %1385 = vpow2.f32 %v942_v24  ;;  %v958_v4 = vmul.f32 1.442695, %v2548_v42  ;;  %v2551_v11 = vsub.f32 %v1883_v52, %v1889_v59  ;;  %v2554_v59 = vsub.f32 %v1709_v14, %v1891_v51 }
 0x307   : > { %v2088_v62 = vpop.eup %1367  ;;  %1387 = vpow2.f32 %v946_v47  ;;  %v977_v18 = vadd.f32 %v2037_v53, %v976_v63  ;;  %v2552_v47 = vsub.f32 %v1699_v3, %v1891_v51  ;;  %v2553_v63 = vsub.f32 %v1703_v5, %v1891_v51 }
 0x308   : > { %2549 = vst [vmem:[#allocation17_spill] sm:$0xff] %v2088_v62  ;;  %v2094_v10 = vpop.eup %1369  ;;  %1389 = vpow2.f32 %v950_v38  ;;  %v966_v24 = vmul.f32 1.442695, %v2551_v11  ;;  %v852_v52 = vmul.f32 1.442695, %v2554_v59  ;;  %v2555_v3 = vsub.f32 %v1717_v17, %v1891_v51 }
 0x309   : > { %v2099_v61 = vpop.eup %1371  ;;  %1391 = vpow2.f32 %v954_v58  ;;  %v978_v7 = vadd.f32 %v2044_v12, %v977_v18  ;;  %v844_v42 = vmul.f32 1.442695, %v2552_v47  ;;  %v848_v38 = vmul.f32 1.442695, %v2553_v63 }
 0x30a   : > { %v2105_v54 = vpop.eup %1373  ;;  %1393 = vpow2.f32 %v958_v4  ;;  %v856_v18 = vmul.f32 1.442695, %v2555_v3  ;;  %v2556_v4 = vsub.f32 %v1724_v21, %v1891_v51  ;;  %v2557_v5 = vsub.f32 %v1730_v25, %v1891_v51 }
 0x30b   : > { %v2113_v48 = vpop.eup %1375  ;;  %1395 = vpow2.f32 %v962_v56  ;;  %v979_v58 = vadd.f32 %v2052_v55, %v978_v7  ;;  %v2558_v56 = vsub.f32 %v1736_v29, %v1891_v51  ;;  %v2559_v7 = vsub.f32 %v1742_v33, %v1891_v51 }
 0x30c   : > { %v860_v11 = vmul.f32 1.442695, %v2556_v4  ;;  %v2122_v47 = vpop.eup %1377  ;;  %1397 = vpow2.f32 %v966_v24  ;;  %v864_v14 = vmul.f32 1.442695, %v2557_v5  ;;  %v2560_v24 = vsub.f32 %v1748_v37, %v1891_v51 }
 0x30d   : > { %v868_v63 = vmul.f32 1.442695, %v2558_v56  ;;  %v872_v17 = vmul.f32 1.442695, %v2559_v7  ;;  %v2133_v59 = vpop.eup %1379  ;;  %v980_v21 = vadd.f32 %v2058_v1, %v979_v58  ;;  %1399 = vpow2.f32 %v844_v42 }
 0x30e   : > { %v876_v3 = vmul.f32 1.442695, %v2560_v24  ;;  %v2561_v25 = vsub.f32 %v1754_v41, %v1891_v51  ;;  %v2142_v5 = vpop.eup %1381  ;;  %1401 = vpow2.f32 %v848_v38 }
 0x30f   : > { %v2150_v58 = vpop.eup %1383  ;;  %v981_v37 = vadd.f32 %v2064_v13, %v980_v21  ;;  %1403 = vpow2.f32 %v852_v52 }
 0x310   : > { %v880_v4 = vmul.f32 1.442695, %v2561_v25  ;;  %v2157_v56 = vpop.eup %1385  ;;  %1405 = vpow2.f32 %v856_v18  ;;  %v2562_v18 = vsub.f32 %v1760_v45, %v1891_v51  ;;  %v2563_v25 = vsub.f32 %v2523_v22, %v1891_v51 }
 0x311   : > { %v2165_v21 = vpop.eup %1387  ;;  %v982_v52 = vadd.f32 %v2071_v34, %v981_v37  ;;  %1407 = vpow2.f32 %v860_v11 }
 0x312   : > { %v2172_v41 = vpop.eup %1389  ;;  %1409 = vpow2.f32 %v864_v14  ;;  %v884_v38 = vmul.f32 1.442695, %v2562_v18  ;;  %v888_v24 = vmul.f32 1.442695, %v2563_v25 }
 0x313   : > { %v2180_v37 = vpop.eup %1391  ;;  %v983_v11 = vadd.f32 %v2077_v60, %v982_v52  ;;  %1411 = vpow2.f32 %v868_v63  ;;  %v2564_v63 = vsub.f32 %v2524_v8, %v1891_v51  ;;  %v2569_v8 = vsub.f32 %v2529_v0, %v1891_v51 }
 0x314   : > { %v2188_v42 = vpop.eup %1393  ;;  %1413 = vpow2.f32 %v872_v17  ;;  %v2565_v17 = vsub.f32 %v2525_v9, %v1891_v51  ;;  %v2568_v9 = vsub.f32 %v2528_v50, %v1891_v51  ;;  %v2572_v0 = vsub.f32 %v2532_v35, %v1891_v51 }
 0x315   : > { %v2193_v7 = vpop.eup %1395  ;;  %v984_v33 = vadd.f32 %v2083_v46, %v983_v11  ;;  %1415 = vpow2.f32 %v876_v3  ;;  %v892_v45 = vmul.f32 1.442695, %v2564_v63  ;;  %v2566_v3 = vsub.f32 %v2526_v32, %v1891_v51 }
 0x316   : > { %v2201_v18 = vpop.eup %1397  ;;  %1417 = vpow2.f32 %v880_v4  ;;  %v896_v22 = vmul.f32 1.442695, %v2565_v17  ;;  %v2567_v4 = vsub.f32 %v2527_v40, %v1891_v51  ;;  %v908_v17 = vmul.f32 1.442695, %v2568_v9 }
 0x317   : > { %v1400_v25 = vpop.eup %1399  ;;  %v985_v14 = vadd.f32 %v2088_v62, %v984_v33  ;;  %1419 = vpow2.f32 %v884_v38  ;;  %v900_v11 = vmul.f32 1.442695, %v2566_v3  ;;  %v2570_v40 = vsub.f32 %v2530_v49, %v1891_v51 }
 0x318   : > { %v1402_v63 = vpop.eup %1401  ;;  %1421 = vpow2.f32 %v888_v24  ;;  %v904_v52 = vmul.f32 1.442695, %v2567_v4  ;;  %v912_v24 = vmul.f32 1.442695, %v2569_v8  ;;  %v924_v8 = vmul.f32 1.442695, %v2572_v0 }
 0x319   : > { %v1404_v29 = vpop.eup %1403  ;;  %v986_v33 = vadd.f32 %v2094_v10, %v985_v14  ;;  %1423 = vpow2.f32 %v892_v45  ;;  %v1007_v38 = vadd.f32 %v1402_v63, %v1400_v25  ;;  %v1045_v32 = vpack.c.bf16 %v1402_v63, %v1400_v25 }
 0x31a   : > { %v1406_v3 = vpop.eup %1405  ;;  %1425 = vpow2.f32 %v896_v22  ;;  %v916_v4 = vmul.f32 1.442695, %v2570_v40  ;;  %v2571_v22 = vsub.f32 %v2531_v36, %v1891_v51  ;;  %v2573_v49 = vpack.c.bf16 %v1983_v43, %v1975_v27 }
 0x31b   : > { %v1408_v62 = vpop.eup %1407  ;;  %v987_v50 = vadd.f32 %v2099_v61, %v986_v33  ;;  %1427 = vpow2.f32 %v900_v11  ;;  %v1008_v9 = vadd.f32 %v1404_v29, %v1007_v38  ;;  %1084 = vmatprep.subr.bf16.mxu0 %v1045_v32  ;;  %v1047_v14 = vpack.c.bf16 %v1406_v3, %v1404_v29 }
 0x31c   : > { %v1410_v45 = vpop.eup %1409  ;;  %1429 = vpow2.f32 %v904_v52  ;;  %v920_v25 = vmul.f32 1.442695, %v2571_v22  ;;  %1085 = vmatpush1.bf16.msra.mxu0 %v2573_v49  ;;  %v2574_v36 = vsub.f32 %v2533_v31, %v1891_v51  ;;  %v2575_v35 = vsub.f32 %v2534_v20, %v1891_v51  ;;  %v2580_v49 = vld [vmem:[#allocation32_spill] sm:$0xff] }
 0x31d   : > { %v1412_v63 = vpop.eup %1411  ;;  %v988_v11 = vadd.f32 %v2105_v54, %v987_v50  ;;  %1431 = vpow2.f32 %v908_v17  ;;  %v1009_v33 = vadd.f32 %v1406_v3, %v1008_v9  ;;  %1086 = vmatprep.subr.bf16.mxu0 %v1047_v14  ;;  %v1049_v29 = vpack.c.bf16 %v1410_v45, %v1408_v62 }
 0x31e   : > { %v1414_v52 = vpop.eup %1413  ;;  %1433 = vpow2.f32 %v912_v24  ;;  %v928_v38 = vmul.f32 1.442695, %v2574_v36  ;;  %v932_v32 = vmul.f32 1.442695, %v2575_v35  ;;  %v2576_v3 = vsub.f32 %v2535_v19, %v1891_v51 }
 0x31f   : > { %v1416_v40 = vpop.eup %1415  ;;  %v989_v27 = vadd.f32 %v2113_v48, %v988_v11  ;;  %1435 = vpow2.f32 %v916_v4  ;;  %v1010_v43 = vadd.f32 %v1408_v62, %v1009_v33  ;;  %v1051_v50 = vpack.c.bf16 %v1414_v52, %v1412_v63 }
 0x320   : > { %v1418_v17 = vpop.eup %1417  ;;  %1437 = vpow2.f32 %v920_v25  ;;  %v936_v24 = vmul.f32 1.442695, %v2576_v3  ;;  %v2577_v31 = vsub.f32 %v2536_v44, %v1891_v51  ;;  %v2578_v20 = vpack.c.bf16 %v1999_v28, %v1991_v30 }
 0x321   : > { %v1420_v14 = vpop.eup %1419  ;;  %v990_v22 = vadd.f32 %v2122_v47, %v989_v27  ;;  %1439 = vpow2.f32 %v924_v8  ;;  %v1011_v62 = vadd.f32 %v1410_v45, %v1010_v43  ;;  %v1053_v4 = vpack.c.bf16 %v1418_v17, %v1416_v40 }
 0x322   : > { %v940_v9 = vmul.f32 1.442695, %v2577_v31  ;;  %1087 = vmatpush1.bf16.msra.mxu0 %v2578_v20  ;;  %v1422_v25 = vpop.eup %1421  ;;  %1441 = vpow2.f32 %v928_v38  ;;  %v2579_v19 = vsub.f32 %v2537_v6, %v1891_v51  ;;  %v2581_v44 = vsub.f32 %v2580_v49, %v1891_v51  ;;  %v2583_v38 = vld [vmem:[#allocation34_spill] sm:$0xff] }
 0x323   : > { %1088 = vmatprep.subr.bf16.mxu0 %v1049_v29  ;;  %v1424_v33 = vpop.eup %1423  ;;  %v991_v30 = vadd.f32 %v2133_v59, %v990_v22  ;;  %1443 = vpow2.f32 %v932_v32  ;;  %v1012_v28 = vadd.f32 %v1412_v63, %v1011_v62  ;;  %v1055_v36 = vpack.c.bf16 %v1422_v25, %v1420_v14 }
 0x324   : > { %v944_v0 = vmul.f32 1.442695, %v2579_v19  ;;  %v948_v11 = vmul.f32 1.442695, %v2581_v44  ;;  %v1426_v8 = vpop.eup %1425  ;;  %1445 = vpow2.f32 %v936_v24  ;;  %v2582_v45 = vsub.f32 %v2539_v16, %v1891_v51 }
 0x325   : > { %v2584_v6 = vsub.f32 %v2583_v38, %v1891_v51  ;;  %v2585_v27 = vpack.c.bf16 %v2014_v39, %v2007_v26  ;;  %v1428_v43 = vpop.eup %1427  ;;  %v992_v3 = vadd.f32 %v2142_v5, %v991_v30  ;;  %1447 = vpow2.f32 %v940_v9 }
 0x326   : > { %v952_v29 = vmul.f32 1.442695, %v2582_v45  ;;  %v1013_v63 = vadd.f32 %v1414_v52, %v1012_v28  ;;  %v1057_v32 = vpack.c.bf16 %v1426_v8, %v1424_v33  ;;  %v1430_v24 = vpop.eup %1429  ;;  %1449 = vpow2.f32 %v944_v0  ;;  %v2588_v52 = vld [vmem:[#allocation37_spill] sm:$0xff] }
 0x327   : > { %v956_v35 = vmul.f32 1.442695, %v2584_v6  ;;  %1089 = vmatpush1.bf16.msra.mxu0 %v2585_v27  ;;  %v2586_v16 = vsub.f32 %v2541_v2, %v1891_v51  ;;  %v2587_v20 = vsub.f32 %v2542_v57, %v1891_v51  ;;  %v1432_v62 = vpop.eup %1431  ;;  %v993_v39 = vadd.f32 %v2150_v58, %v992_v3 }
 0x328   : > { %1090 = vmatprep.subr.bf16.mxu0 %v1051_v50  ;;  %1451 = vpow2.f32 %v948_v11  ;;  %v1014_v26 = vadd.f32 %v1416_v40, %v1013_v63  ;;  %v1059_v19 = vpack.c.bf16 %v1430_v24, %v1428_v43  ;;  %v1434_v9 = vpop.eup %1433  ;;  %v2589_v50 = vsub.f32 %v2588_v52, %v1891_v51 }
 0x329   : > { %v960_v31 = vmul.f32 1.442695, %v2586_v16  ;;  %v964_v22 = vmul.f32 1.442695, %v2587_v20  ;;  %1453 = vpow2.f32 %v952_v29  ;;  %v2590_v2 = vpack.c.bf16 %v2029_v15, %v2022_v23  ;;  %v1436_v49 = vpop.eup %1435 }
 0x32a   : > { %v968_v0 = vmul.f32 1.442695, %v2589_v50  ;;  %v994_v57 = vadd.f32 %v2157_v56, %v993_v39  ;;  %1455 = vpow2.f32 %v956_v35  ;;  %v1015_v44 = vadd.f32 %v1418_v17, %v1014_v26  ;;  %v1438_v11 = vpop.eup %1437 }
 0x32b   : > { %1091 = vmatpush1.bf16.msra.mxu0 %v2590_v2  ;;  %v1061_v30 = vpack.c.bf16 %v1434_v9, %v1432_v62  ;;  %1457 = vpow2.f32 %v960_v31  ;;  %v1440_v40 = vpop.eup %1439  ;;  %v1063_v51 = vpack.c.bf16 %v1438_v11, %v1436_v49  ;;  %v2591_v15 = vpack.c.bf16 %v2044_v12, %v2037_v53 }
 0x32c   : > { %1092 = vmatprep.subr.bf16.mxu0 %v1053_v4  ;;  %v995_v28 = vadd.f32 %v2165_v21, %v994_v57  ;;  %1459 = vpow2.f32 %v964_v22  ;;  %v1016_v45 = vadd.f32 %v1420_v14, %v1015_v44  ;;  %v1442_v29 = vpop.eup %1441  ;;  %v2592_v16 = vpack.c.bf16 %v2058_v1, %v2052_v55 }
 0x32d   : > { %1461 = vpow2.f32 %v968_v0  ;;  %v1444_v23 = vpop.eup %1443  ;;  %v1065_v4 = vpack.c.bf16 %v1442_v29, %v1440_v40  ;;  %v2594_v57 = vpack.c.bf16 %v2083_v46, %v2077_v60  ;;  %v2598_v60 = vpack.c.bf16 %v2122_v47, %v2113_v48 }
 0x32e   : > { %v996_v38 = vadd.f32 %v2172_v41, %v995_v28  ;;  %v1017_v17 = vadd.f32 %v1422_v25, %v1016_v45  ;;  %v1446_v6 = vpop.eup %1445  ;;  %v2595_v28 = vld [vmem:[#allocation17_spill] sm:$0xff]  ;;  %v2601_v48 = vpack.c.bf16 %v2172_v41, %v2165_v21  ;;  %v2608_v41 = vld [vmem:[#allocation7_spill] sm:$0xff] }
 0x32f   : > { %1093 = vmatpush1.bf16.msra.mxu0 %v2591_v15  ;;  %v1448_v35 = vpop.eup %1447  ;;  %v1067_v63 = vpack.c.bf16 %v1446_v6, %v1444_v23  ;;  %v2607_v15 = vld [vmem:[#allocation8_spill] sm:$0xff] }
 0x330   : > { %1094 = vmatprep.subr.bf16.mxu0 %v1055_v36  ;;  %v997_v27 = vadd.f32 %v2180_v37, %v996_v38  ;;  %v1018_v3 = vadd.f32 %v1424_v33, %v1017_v17  ;;  %v1450_v14 = vpop.eup %1449  ;;  %v2593_v33 = vpack.c.bf16 %v2071_v34, %v2064_v13  ;;  %v2596_v13 = vpack.c.bf16 %v2094_v10, %v2595_v28  ;;  %v2611_v38 = vld [vmem:[#allocation5_spill] sm:$0xff] }
 0x331   : > { %v1069_v20 = vpack.c.bf16 %v1450_v14, %v1448_v35  ;;  %v2599_v10 = vpack.c.bf16 %v2142_v5, %v2133_v59  ;;  %v2602_v59 = vpack.c.bf16 %v2188_v42, %v2180_v37  ;;  %v2609_v21 = vpack.c.bf16 %v2607_v15, %v2608_v41  ;;  %v2614_v37 = vld [vmem:[#allocation11_spill] sm:$0xff] }
 0x332   : > { %v1452_v31 = vpop.eup %1451  ;;  %v998_v12 = vadd.f32 %v2188_v42, %v997_v27  ;;  %v1019_v53 = vadd.f32 %v1426_v8, %v1018_v3  ;;  %v2613_v42 = vld [vmem:[#allocation12_spill] sm:$0xff]  ;;  %v2620_v27 = vld [vmem:[#allocation14_spill] sm:$0xff] }
 0x333   : > { %1095 = vmatpush1.bf16.msra.mxu0 %v2592_v16  ;;  %v1454_v25 = vpop.eup %1453 }
 0x334   : > { %1096 = vmatprep.subr.bf16.mxu0 %v1057_v32  ;;  %v1456_v36 = vpop.eup %1455  ;;  %v999_v22 = vadd.f32 %v2193_v7, %v998_v12  ;;  %v1020_v39 = vadd.f32 %v1428_v43, %v1019_v53  ;;  %v1071_v26 = vpack.c.bf16 %v1454_v25, %v1452_v31 }
 0x335   : > { %v1458_v52 = vpop.eup %1457 }
 0x336   : > { %v1460_v50 = vpop.eup %1459  ;;  %v1000_v1 = vadd.f32 %v2201_v18, %v999_v22  ;;  %v1021_v55 = vadd.f32 %v1430_v24, %v1020_v39  ;;  %v1073_v0 = vpack.c.bf16 %v1458_v52, %v1456_v36  ;;  %v2597_v24 = vpack.c.bf16 %v2105_v54, %v2099_v61 }
 0x337   : > { %1097 = vmatpush1.bf16.msra.mxu0 %v2593_v33  ;;  %v1462_v8 = vpop.eup %1461  ;;  %v2600_v61 = vpack.c.bf16 %v2157_v56, %v2150_v58  ;;  %v2603_v58 = vpack.c.bf16 %v2201_v18, %v2193_v7  ;;  %v2604_v56 = vld [vmem:[#allocation4_spill] sm:$0xff] }
 0x338   : > { %1098 = vmatprep.subr.bf16.mxu0 %v1059_v19  ;;  %v1022_v32 = vadd.f32 %v1432_v62, %v1021_v55  ;;  %v1075_v2 = vpack.c.bf16 %v1462_v8, %v1460_v50  ;;  %v2619_v18 = vld [vmem:[#allocation16_spill] sm:$0xff] }
 0x339   : > { %v2621_v3 = vpack.c.bf16 %v2619_v18, %v2620_v27 }
 0x33a   : > { %v1023_v43 = vadd.f32 %v1434_v9, %v1022_v32 }
 0x33b   : > { %1099 = vmatpush1.bf16.msra.mxu0 %v2594_v57 }
 0x33c   : > { %1100 = vmatprep.subr.bf16.mxu0 %v1061_v30  ;;  %v1024_v44 = vadd.f32 %v1436_v49, %v1023_v43 }
 0x33e   : > { %v1025_v34 = vadd.f32 %v1438_v11, %v1024_v44 }
 0x33f   : > { %1101 = vmatpush1.bf16.msra.mxu0 %v2596_v13 }
 0x340   : > { %1102 = vmatprep.subr.bf16.mxu0 %v1063_v51  ;;  %v1026_v45 = vadd.f32 %v1440_v40, %v1025_v34  ;;  %v2605_v51 = vld [vmem:[#allocation3_spill] sm:$0xff] }
 0x342   : > { %v1027_v62 = vadd.f32 %v1442_v29, %v1026_v45  ;;  %v2606_v29 = vpack.c.bf16 %v2604_v56, %v2605_v51 }
 0x343   : > { %1103 = vmatpush1.bf16.msra.mxu0 %v2597_v24  ;;  %v1467_v24 = vld [vmem:[%s1539_s21] sm:$0xff] }
 0x344   : > { %1104 = vmatprep.subr.bf16.mxu0 %v1065_v4  ;;  %v1028_v19 = vadd.f32 %v1444_v23, %v1027_v62  ;;  %v2610_v23 = vld [vmem:[#allocation6_spill] sm:$0xff]  ;;  %v2615_v4 = vpack.c.bf16 %v2613_v42, %v2614_v37 }
 0x345   : > { %v2612_v17 = vpack.c.bf16 %v2610_v23, %v2611_v38  ;;  %v1474_v37 = vld [vmem:[%s1539_s21 + $0x38] sm:$0xff] }
 0x346   : > { %v1029_v46 = vadd.f32 %v1446_v6, %v1028_v19  ;;  %v2616_v6 = vld [vmem:[#allocation10_spill] sm:$0xff] }
 0x347   : > { %1105 = vmatpush1.bf16.msra.mxu0 %v2598_v60  ;;  %v1468_v60 = vld [vmem:[%s1539_s21 + $0x8] sm:$0xff] }
 0x348   : > { %1106 = vmatprep.subr.bf16.mxu0 %v1067_v63  ;;  %v1030_v9 = vadd.f32 %v1448_v35, %v1029_v46  ;;  %v2617_v35 = vld [vmem:[#allocation9_spill] sm:$0xff]  ;;  %v2622_v63 = vld [vmem:[#allocation15_spill] sm:$0xff] }
 0x349   : > { %v2618_v7 = vpack.c.bf16 %v2616_v6, %v2617_v35 }
 0x34a   : > { %v1031_v49 = vadd.f32 %v1450_v14, %v1030_v9  ;;  %v2623_v14 = vld [vmem:[#allocation13_spill] sm:$0xff] }
 0x34b   : > { %1107 = vmatpush1.bf16.msra.mxu0 %v2599_v10  ;;  %v2624_v16 = vpack.c.bf16 %v2622_v63, %v2623_v14  ;;  %v1469_v10 = vld [vmem:[%s1539_s21 + $0x10] sm:$0xff] }
 0x34c   : > { %1108 = vmatprep.subr.bf16.mxu0 %v1069_v20  ;;  %v1032_v30 = vadd.f32 %v1452_v31, %v1031_v49  ;;  %v1001_v31 = vrot.slane %v1000_v1, 4 }
 0x34e   : > { %v1033_v54 = vadd.f32 %v1454_v25, %v1032_v30  ;;  %v1002_v53 = vadd.f32 %v1001_v31, %v1000_v1  ;;  %v1470_v30 = vld [vmem:[%s1539_s21 + $0x18] sm:$0xff] }
 0x34f   : > { %1109 = vmatpush1.bf16.msra.mxu0 %v2600_v61 }
 0x350   : > { %1110 = vmatprep.subr.bf16.mxu0 %v1071_v26  ;;  %v1034_v11 = vadd.f32 %v1456_v36, %v1033_v54  ;;  %v1003_v25 = vrot.slane %v1002_v53, 2 }
 0x352   : > { %v1035_v47 = vadd.f32 %v1458_v52, %v1034_v11  ;;  %v1004_v22 = vadd.f32 %v1003_v25, %v1002_v53  ;;  %v1476_v25 = vld [vmem:[%s1539_s21 + $0x48] sm:$0xff] }
 0x353   : > { %1111 = vmatpush1.bf16.msra.mxu0 %v2601_v48 }
 0x354   : > { %1112 = vmatprep.subr.bf16.mxu0 %v1073_v0  ;;  %v1036_v40 = vadd.f32 %v1460_v50, %v1035_v47  ;;  %v1005_v26 = vrot.slane %v1004_v22, 1 }
 0x356   : > { %v1037_v5 = vadd.f32 %v1462_v8, %v1036_v40  ;;  %v1006_v33 = vadd.f32 %v1005_v26, %v1004_v22  ;;  %v2349_v8 = vstv %s220_s29 }
 0x357   : > { %1113 = vmatpush1.bf16.msra.mxu0 %v2602_v59 }
 0x358   : > { %1114 = vmatprep.subr.bf16.mxu0 %v1075_v2  ;;  %v1038_v12 = vrot.slane %v1037_v5, 4  ;;  %1463 = vrcp.f32 %v1006_v33 }
 0x35a   : > { %v1039_v20 = vadd.f32 %v1038_v12, %v1037_v5  ;;  %v1475_v12 = vld [vmem:[%s1539_s21 + $0x40] sm:$0xff] }
 0x35b   : > { %1115 = vmatpush1.bf16.msra.mxu0 %v2603_v58 }
 0x35c   : > { %v1040_v36 = vrot.slane %v1039_v20, 2 }
 0x35e   : > { %1117 = vmatmul.mubr.bf16.vlgmr.msra.gmra.mrb[20].mxu0 %v2606_v29  ;;  %v1041_v39 = vadd.f32 %v1040_v36, %v1039_v20  ;;  %v1471_v29 = vld [vmem:[%s1539_s21 + $0x20] sm:$0xff] }
 0x35f   : > { %1126 = vmatprep.mubr.bf16.mxu0 %v2609_v21  ;;  %v1472_v21 = vld [vmem:[%s1539_s21 + $0x28] sm:$0xff] }
 0x360   : > { %v1042_v52 = vrot.slane %v1041_v39, 1 }
 0x362   : > { %v1043_v50 = vadd.f32 %v1042_v52, %v1041_v39  ;;  %v2347_v55 = vpop.eup %1463  ;;  %v1477_v39 = vld [vmem:[%s1539_s21 + $0x50] sm:$0xff]  ;;  %v1478_v52 = vld [vmem:[%s1539_s21 + $0x58] sm:$0xff] }
 0x364   : > { %1465 = vrcp.f32 %v1043_v50 }
 0x366   : > { %1127 = vmatmul.mubr.bf16.gmra.mrb[24].mxu0 %v2612_v17  ;;  %v1473_v17 = vld [vmem:[%s1539_s21 + $0x30] sm:$0xff] }
 0x367   : > { %1136 = vmatprep.mubr.bf16.mxu0 %v2615_v4 }
 0x36e   : > { %1137 = vmatmul.mubr.bf16.gmra.mrb[28].mxu0 %v2618_v7  ;;  %v2351_v1 = vpop.eup %1465 }
 0x36f   : > { %1146 = vmatprep.mubr.bf16.mxu0 %v2621_v3 }
 0x376   : > { %1147 = vmatmul.mubr.bf16.gmra.mrb[32].mxu0 %v2624_v16 }
 0x431   : > { %v1118_v0 = vpop.f32.mrb[20].mxu0 }
 0x432   : > { %v1159_v32 = vmul.f32 %v2347_v55, %v1118_v0  ;;  %v1120_v2 = vpop.f32.mrb[21].mxu0 }
 0x433   : > { %v1160_v57 = vmul.f32 %v2351_v1, %v1120_v2  ;;  %v1122_v43 = vpop.f32.mrb[22].mxu0 }
 0x434   : > { %v1176_v44 = vmul.f32 %v2349_v8, %v1159_v32  ;;  %v1161_v28 = vmul.f32 %v2347_v55, %v1122_v43  ;;  %v1124_v13 = vpop.f32.mrb[23].mxu0 }
 0x435   : > { %v1177_v34 = vmul.f32 %v2349_v8, %v1160_v57  ;;  %v1162_v45 = vmul.f32 %v2351_v1, %v1124_v13 }
 0x436   : > { %v1192_v62 = vadd.f32 %v1467_v24, %v1176_v44  ;;  %v1178_v19 = vmul.f32 %v2349_v8, %v1161_v28 }
 0x437   : > { %v1193_v46 = vadd.f32 %v1468_v60, %v1177_v34  ;;  %v1179_v9 = vmul.f32 %v2349_v8, %v1162_v45  ;;  %v1479_v45 = vld [vmem:[%s1539_s21 + $0x60] sm:$0xff] }
 0x438   : > { %1208 = vst [vmem:[%s2362_s6] sm:$0xff] %v1192_v62  ;;  %v1194_v49 = vadd.f32 %v1469_v10, %v1178_v19  ;;  %v1480_v19 = vld [vmem:[%s1539_s21 + $0x68] sm:$0xff] }
 0x439   : > { %1209 = vst [vmem:[%s2362_s6 + $0x8] sm:$0xff] %v1193_v46  ;;  %v1195_v61 = vadd.f32 %v1470_v30, %v1179_v9  ;;  %v1128_v54 = vpop.f32.mrb[24].mxu0  ;;  %v1481_v9 = vld [vmem:[%s1539_s21 + $0x70] sm:$0xff] }
 0x43a   : > { %1210 = vst [vmem:[%s2362_s6 + $0x10] sm:$0xff] %v1194_v49  ;;  %v1163_v11 = vmul.f32 %v2347_v55, %v1128_v54  ;;  %v1130_v48 = vpop.f32.mrb[25].mxu0 }
 0x43b   : > { %1211 = vst [vmem:[%s2362_s6 + $0x18] sm:$0xff] %v1195_v61  ;;  %v1164_v47 = vmul.f32 %v2351_v1, %v1130_v48  ;;  %v1132_v40 = vpop.f32.mrb[26].mxu0 }
 0x43c   : > { %v1180_v59 = vmul.f32 %v2349_v8, %v1163_v11  ;;  %v1165_v5 = vmul.f32 %v2347_v55, %v1132_v40  ;;  %v1134_v58 = vpop.f32.mrb[27].mxu0 }
 0x43d   : > { %v1181_v56 = vmul.f32 %v2349_v8, %v1164_v47  ;;  %v1166_v51 = vmul.f32 %v2351_v1, %v1134_v58 }
 0x43e   : > { %v1196_v15 = vadd.f32 %v1471_v29, %v1180_v59  ;;  %v1182_v41 = vmul.f32 %v2349_v8, %v1165_v5 }
 0x43f   : > { %v1197_v23 = vadd.f32 %v1472_v21, %v1181_v56  ;;  %v1183_v38 = vmul.f32 %v2349_v8, %v1166_v51 }
 0x440   : > { %1212 = vst [vmem:[%s2362_s6 + $0x20] sm:$0xff] %v1196_v15  ;;  %v1198_v42 = vadd.f32 %v1473_v17, %v1182_v41 }
 0x441   : > { %1213 = vst [vmem:[%s2362_s6 + $0x28] sm:$0xff] %v1197_v23  ;;  %v1199_v4 = vadd.f32 %v1474_v37, %v1183_v38  ;;  %v1138_v6 = vpop.f32.mrb[28].mxu0 }
 0x442   : > { %1214 = vst [vmem:[%s2362_s6 + $0x30] sm:$0xff] %v1198_v42  ;;  %v1167_v35 = vmul.f32 %v2347_v55, %v1138_v6  ;;  %v1140_v7 = vpop.f32.mrb[29].mxu0 }
 0x443   : > { %1215 = vst [vmem:[%s2362_s6 + $0x38] sm:$0xff] %v1199_v4  ;;  %v1168_v18 = vmul.f32 %v2351_v1, %v1140_v7  ;;  %v1142_v27 = vpop.f32.mrb[30].mxu0 }
 0x444   : > { %v1184_v3 = vmul.f32 %v2349_v8, %v1167_v35  ;;  %v1169_v63 = vmul.f32 %v2347_v55, %v1142_v27  ;;  %v1144_v14 = vpop.f32.mrb[31].mxu0 }
 0x445   : > { %v1185_v16 = vmul.f32 %v2349_v8, %v1168_v18  ;;  %v1170_v31 = vmul.f32 %v2351_v1, %v1144_v14 }
 0x446   : > { %v1200_v53 = vadd.f32 %v1475_v12, %v1184_v3  ;;  %v1186_v20 = vmul.f32 %v2349_v8, %v1169_v63 }
 0x447   : > { %v1201_v36 = vadd.f32 %v1476_v25, %v1185_v16  ;;  %v1187_v22 = vmul.f32 %v2349_v8, %v1170_v31 }
 0x448   : > { %1216 = vst [vmem:[%s2362_s6 + $0x40] sm:$0xff] %v1200_v53  ;;  %v1202_v26 = vadd.f32 %v1477_v39, %v1186_v20 }
 0x449   : > { %1217 = vst [vmem:[%s2362_s6 + $0x48] sm:$0xff] %v1201_v36  ;;  %v1203_v33 = vadd.f32 %v1478_v52, %v1187_v22  ;;  %v1148_v50 = vpop.f32.mrb[32].mxu0 }
 0x44a   : > { %1218 = vst [vmem:[%s2362_s6 + $0x50] sm:$0xff] %v1202_v26  ;;  %v1171_v0 = vmul.f32 %v2347_v55, %v1148_v50  ;;  %v1150_v32 = vpop.f32.mrb[33].mxu0 }
 0x44b   : > { %1219 = vst [vmem:[%s2362_s6 + $0x58] sm:$0xff] %v1203_v33  ;;  %v1172_v2 = vmul.f32 %v2351_v1, %v1150_v32  ;;  %v1152_v57 = vpop.f32.mrb[34].mxu0 }
 0x44c   : > { %v1188_v43 = vmul.f32 %v2349_v8, %v1171_v0  ;;  %v1173_v44 = vmul.f32 %v2347_v55, %v1152_v57  ;;  %v1154_v28 = vpop.f32.mrb[35].mxu0  ;;  %v1482_v55 = vld [vmem:[%s1539_s21 + $0x78] sm:$0xff] }
 0x44d   : > { %v1189_v13 = vmul.f32 %v2349_v8, %v1172_v2  ;;  %v1174_v34 = vmul.f32 %v2351_v1, %v1154_v28 }
 0x44e   : > { %v1204_v24 = vadd.f32 %v1479_v45, %v1188_v43  ;;  %v1190_v62 = vmul.f32 %v2349_v8, %v1173_v44 }
 0x44f   : > { %v1205_v60 = vadd.f32 %v1480_v19, %v1189_v13  ;;  %v1191_v46 = vmul.f32 %v2349_v8, %v1174_v34 }
 0x450   : > { %1220 = vst [vmem:[%s2362_s6 + $0x60] sm:$0xff] %v1204_v24  ;;  %v1206_v10 = vadd.f32 %v1481_v9, %v1190_v62 }
 0x451   : > { %1221 = vst [vmem:[%s2362_s6 + $0x68] sm:$0xff] %v1205_v60  ;;  %v1207_v49 = vadd.f32 %v1482_v55, %v1191_v46 }
 0x452   : > { %1222 = vst [vmem:[%s2362_s6 + $0x70] sm:$0xff] %v1206_v10 }
 0x453   : > { %1223 = vst [vmem:[%s2362_s6 + $0x78] sm:$0xff] %v1207_v49 }
 0x454 PF: > { %s15_s17 = sadd.s32 1, %s1489_s17  }
 0x455   : > { %p12_p4 = scmp.ge.s32.totalorder %s15_s17, 4  }
 0x457   :  { %14 = sbr.rel (!%p12_p4) target bundleno = 2 (0x2), region = 66 }

</bundles_post_ra>
